<compile_context>
chip_gen: v5e
topology: v5e:2x2
jax: 0.10.0
libtpu: 0.0.40
codegen_flags: <defaults>
</compile_context>

<pallas_src>
import jax
import jax.numpy as jnp
from jax.experimental import pallas as pl
from jax.experimental.pallas import tpu as pltpu


def cnn_bilstm_forward(x, params, *, tile_b=512, conv_chunk=1024,
                       compute_dtype=jnp.float32, vmem_limit_bytes=None):
    """Fused CNN-BiLSTM forward pass."""
    B, D = x.shape
    ks, K = params["conv_w_t"].shape
    # TODO(synk): even kernel_size gives D+1 conv timesteps in PyTorch (padding=ks//2);
    # only the odd case (output length == D) is implemented here.
    assert ks % 2 == 1, "kernel_size must be odd"
    pad = ks // 2
    H = params["w_fwd"].shape[1] // 4
    F2 = params["fc1_w"].shape[1]
    cd = jnp.dtype(compute_dtype)

    # ---------------- host-side weight packing ---------------------------------
    def igo(w):  # (i, g, o) columns; forget gate dropped (c0 == 0 kills it)
        return w[:, 0:H], w[:, 2 * H:3 * H], w[:, 3 * H:4 * H]

    wi_f, wg_f, wo_f = igo(params["w_fwd"])
    wi_r, wg_r, wo_r = igo(params["w_rev"])
    bi_f, bg_f, bo_f = igo(params["b_fwd"])
    bi_r, bg_r, bo_r = igo(params["b_rev"])
    # Column packing [i_fwd | o_fwd | i_rev | o_rev | g_fwd | g_rev] -> (D, 6H): the
    # four sigmoid gates occupy one contiguous 4H-lane block.
    w_gates = jnp.concatenate([wi_f, wo_f, wi_r, wo_r, wg_f, wg_r], axis=1).astype(cd)
    b_gates = jnp.concatenate(
        [bi_f, bo_f, bi_r, bo_r, bg_f, bg_r], axis=1).astype(jnp.float32)

    w1 = params["fc1_w"]
    w1_cnn = (w1[:K] * (1.0 / D)).astype(jnp.float32)      # fold adaptive-pool 1/D here
    w1_fwd = w1[K:K + H].astype(cd)
    w1_rev = w1[K + H:K + 2 * H].astype(cd)
    b1 = params["fc1_b"].astype(jnp.float32)
    w2_row = params["fc2_w"].reshape(1, F2).astype(jnp.float32)
    b2 = params["fc2_b"].reshape(1).astype(jnp.float32)
    conv_w = params["conv_w_t"].astype(jnp.float32)         # (ks, K) scalars in SMEM
    conv_b = params["conv_b"].reshape(K).astype(jnp.float32)

    # Single streamed tensor: zero-padded x (kernel derives x = xpad[:, pad:pad+D]).
    # TODO(synk): the host-side pad pass could also be removed with in-kernel
    # pltpu.roll + edge masks; kept host-side for robustness at tiny D.
    xpad = jnp.pad(x.astype(cd), ((0, 0), (pad, pad)))
    Dp = D + 2 * pad

    # ---------------- VMEM budget -> batch tile ---------------------------------
    if vmem_limit_bytes is None:
        try:                      # v5e/v6e: 128 MiB physical, v7x: 64 MiB
            phys = pltpu.get_tpu_info().vmem_capacity_bytes
        except Exception:
            phys = 128 * 1024 * 1024
        vmem_limit_bytes = int(min(96 * 1024 * 1024, (phys * 3) // 4))

    dc = min(D, max(128, conv_chunk))            # conv D-chunk (lanes) live at a time
    itemsize = cd.itemsize
    weight_bytes = (D * 6 * H) * itemsize + (K + 2 * H + 2) * F2 * 4 + 6 * H * 4
    row_bytes = (2 * Dp * itemsize               # double-buffered xpad stream
                 + (ks + 1) * dc * itemsize      # shifted chunk slices + z
                 + (6 * H + 2 * F2 + 2 * K) * 4  # gates / pooled / head temporaries
                 + 8)                            # output block
    budget = max(vmem_limit_bytes - weight_bytes - (4 << 20), 1 << 20)
    tile_b = max(8, (tile_b // 8) * 8)
    tb_cap = max(8, (budget // (2 * row_bytes)) // 8 * 8)   # ~2x headroom for regalloc
    tb = min(tile_b, tb_cap, B)
    if B >= 16 and pl.cdiv(B, tb) < 2:           # v7x: 2 TCs need >= 2 "parallel" steps
        tb = max(8, ((B // 2 + 7) // 8) * 8)
    grid = (pl.cdiv(B, tb),)

    # ---------------- kernel ----------------------------------------------------
    def kernel(xp_ref, cw_ref, cb_ref, wg_ref, bg_ref,
               w1c_ref, w1f_ref, w1r_ref, b1_ref, w2_ref, b2_ref, out_ref):
        xp = xp_ref[...]                         # (tb, D + 2*pad), compute dtype
        kd = xp.dtype
        tbk = xp.shape[0]

        # ---- Conv1d(1->K) + ReLU + mean over time, chunked along D ------------
        # Shifted taps are static lane slices of the padded tile; only one
        # (tb, dc) chunk of conv temporaries is live at a time.  All rows are
        # independent, so garbage rows of a partial trailing batch tile are safe.
        pooled = [jnp.zeros((tbk, 1), jnp.float32) for _ in range(K)]
        for c0 in range(0, D, dc):
            cl = min(dc, D - c0)
            sh = [xp[:, c0 + j: c0 + j + cl] for j in range(ks)]
            for k in range(K):                   # K, ks static -> unrolled
                z = sh[0] * cw_ref[0, k].astype(kd)
                for j in range(1, ks):
                    z = z + sh[j] * cw_ref[j, k].astype(kd)
                z = z + cb_ref[k].astype(kd)
                pooled[k] = pooled[k] + jnp.sum(
                    jnp.maximum(z, 0.0).astype(jnp.float32), axis=-1, keepdims=True)

        # ---- Fused BiLSTM, seq_len == 1, h0 = c0 = 0 (forget gate dropped) ----
        x_t = xp[:, pad:pad + D]                 # centre slice == original x
        gates = jnp.dot(x_t, wg_ref[...],
                        preferred_element_type=jnp.float32) + bg_ref[...]
        sig = jax.nn.sigmoid(gates[:, :4 * H])   # [i_f | o_f | i_r | o_r]
        tg = jnp.tanh(gates[:, 4 * H:])          # [g_f | g_r]
        h_fwd = sig[:, H:2 * H] * jnp.tanh(sig[:, 0:H] * tg[:, 0:H])
        h_rev = sig[:, 3 * H:4 * H] * jnp.tanh(sig[:, 2 * H:3 * H] * tg[:, H:2 * H])

        # ---- Head: split fc1 rows + rank-1 conv updates -> ReLU -> fc2 --------
        h1 = (jnp.dot(h_fwd.astype(kd), w1f_ref[...], preferred_element_type=jnp.float32)
              + jnp.dot(h_rev.astype(kd), w1r_ref[...], preferred_element_type=jnp.float32)
              + b1_ref[...])
        w1c = w1c_ref[...]                       # (K, F2), rows pre-scaled by 1/D
        for k in range(K):
            h1 = h1 + pooled[k] * w1c[k:k + 1, :]          # rank-1 VPU update
        h1 = jnp.maximum(h1, 0.0)
        # Dropout is identity in eval mode; fc2 (N=1) as VPU mul + lane reduce.
        out = jnp.sum(h1 * w2_ref[...], axis=-1, keepdims=True) + b2_ref[0]
        out_ref[...] = out.astype(out_ref.dtype)

    # ---------------- specs ------------------------------------------------------
    smem = pl.BlockSpec(memory_space=pltpu.MemorySpace.SMEM)

    def resident(shape):                         # weights: same block every grid step,
        nd = len(shape)                          # single-buffered (no wasted 2x VMEM)
        return pl.BlockSpec(shape, lambda *_: (0,) * nd, pipeline_mode=pl.Buffered(1))

    return pl.pallas_call(
        kernel,
        out_shape=jax.ShapeDtypeStruct((B, 1), jnp.float32),
        grid=grid,
        in_specs=[
            pl.BlockSpec((tb, Dp), lambda i: (i, 0)),      # streamed padded x
            smem, smem,                                    # conv weight (ks,K) / bias (K,)
            resident((D, 6 * H)),                          # fused gate weights
            resident((1, 6 * H)),                          # fused gate bias (f32)
            resident((K, F2)),                             # fc1 rows for conv (pre /D)
            resident((H, F2)),                             # fc1 rows for h_fwd
            resident((H, F2)),                             # fc1 rows for h_rev
            resident((1, F2)),                             # fc1 bias
            resident((1, F2)),                             # fc2 weight row
            smem,                                          # fc2 bias (1,)
        ],
        out_specs=pl.BlockSpec((tb, 1), lambda i: (i, 0)),
        compiler_params=pltpu.CompilerParams(
            dimension_semantics=("parallel",),
            vmem_limit_bytes=int(vmem_limit_bytes)),
    )(xpad, conv_w, conv_b, w_gates, b_gates,
      w1_cnn, w1_fwd, w1_rev, b1, w2_row, b2)


def init_params(key, input_dim, lstm_hidden_dim=32, kernel_num=16, kernel_size=3):
    D, H, K, ks = input_dim, lstm_hidden_dim, kernel_num, kernel_size
    F = K + 2 * H
    F2 = F // 2
    keys = jax.random.split(key, 12)

    def u(k, shape, scale):
        return jax.random.uniform(k, shape, jnp.float32, -scale, scale)

    return {
        # Conv1d(1, K, ks): weight (K, 1, ks) stored transposed as (ks, K)
        "conv_w_t": u(keys[0], (ks, K), 1.0 / ks ** 0.5),
        "conv_b":   u(keys[1], (1, K), 1.0 / ks ** 0.5),
        # LSTM per direction: W_ih (4H, D) stored as (D, 4H); bias = b_ih + b_hh -> (1, 4H)
        "w_fwd": u(keys[2], (D, 4 * H), 1.0 / H ** 0.5),
        "b_fwd": u(keys[3], (1, 4 * H), 1.0 / H ** 0.5),
        "w_rev": u(keys[4], (D, 4 * H), 1.0 / H ** 0.5),
        "b_rev": u(keys[5], (1, 4 * H), 1.0 / H ** 0.5),
        # fc: Linear(F, F2), Linear(F2, 1) -- stored transposed for x @ W
        "fc1_w": u(keys[6], (F, F2), 1.0 / F ** 0.5),
        "fc1_b": u(keys[7], (1, F2), 1.0 / F ** 0.5),
        "fc2_w": u(keys[8], (F2, 1), 1.0 / F2 ** 0.5),
        "fc2_b": u(keys[9], (1, 1), 1.0 / F2 ** 0.5),
    }


def reference_forward(x, p):
    """Pure-JAX reference replicating the PyTorch forward (eval mode)."""
    B, D = x.shape
    ks, K = p["conv_w_t"].shape
    pad = ks // 2
    xp = jnp.pad(x, ((0, 0), (pad, pad)))
    conv = jnp.zeros((B, D, K), jnp.float32)
    for j in range(ks):
        conv = conv + xp[:, j:j + D][:, :, None] * p["conv_w_t"][j][None, None, :]
    conv = conv + p["conv_b"][:, None, :]
    cnn_out = jnp.mean(jax.nn.relu(conv), axis=1)

    def lstm_dir(w, b):
        g = x @ w + b
        H = g.shape[1] // 4
        i, _, gg, o = (jax.nn.sigmoid(g[:, :H]), jax.nn.sigmoid(g[:, H:2 * H]),
                       jnp.tanh(g[:, 2 * H:3 * H]), jax.nn.sigmoid(g[:, 3 * H:]))
        return o * jnp.tanh(i * gg)

    combined = jnp.concatenate(
        [cnn_out, lstm_dir(p["w_fwd"], p["b_fwd"]), lstm_dir(p["w_rev"], p["b_rev"])],
        axis=1)
    h1 = jax.nn.relu(combined @ p["fc1_w"] + p["fc1_b"])
    return h1 @ p["fc2_w"] + p["fc2_b"]


if __name__ == "__main__":
    B, D = 2, 16          # batch=2, input_dim=16
    key = jax.random.PRNGKey(0)
    kx, kp = jax.random.split(key)
    x = jax.random.normal(kx, (B, D), jnp.float32)
    params = init_params(kp, input_dim=D, lstm_hidden_dim=32, kernel_num=16, kernel_size=3)

    out = jax.block_until_ready(cnn_bilstm_forward(x, params))
    ref = jax.block_until_ready(reference_forward(x, params))

    assert out.shape == (B, 1), out.shape
    assert jnp.allclose(out, ref, atol=1e-3, rtol=1e-3), (out, ref)
    print("KERNEL_OK")
</pallas_src>

<mosaic_0001>
module attributes {stable_mosaic.version = 11 : i64} {
  func.func @kernel(%arg0: i32, %arg1: memref<2x18xf32, #tpu.memory_space<vmem>>, %arg2: memref<3x16xf32, #tpu.memory_space<smem>>, %arg3: memref<16xf32, #tpu.memory_space<smem>>, %arg4: memref<16x192xf32, #tpu.memory_space<vmem>>, %arg5: memref<1x192xf32, #tpu.memory_space<vmem>>, %arg6: memref<16x40xf32, #tpu.memory_space<vmem>>, %arg7: memref<32x40xf32, #tpu.memory_space<vmem>>, %arg8: memref<32x40xf32, #tpu.memory_space<vmem>>, %arg9: memref<1x40xf32, #tpu.memory_space<vmem>>, %arg10: memref<1x40xf32, #tpu.memory_space<vmem>>, %arg11: memref<1xf32, #tpu.memory_space<smem>>, %arg12: memref<2x1xf32, #tpu.memory_space<vmem>>) attributes {dimension_semantics = [#tpu.dimension_semantics<parallel>], iteration_bounds = array<i64: 1>, scalar_prefetch = 0 : i64, scratch_operands = 0 : i64, tpu.core_type = #tpu.core_type<tc>, window_params = [{transform_indices = @transform_0, window_bounds = array<i64: 2, 18>}, {transform_indices = @transform_1, window_bounds = array<i64: 3, 16>}, {transform_indices = @transform_2, window_bounds = array<i64: 16>}, {pipeline_mode = #tpu.pipeline_mode<synchronous>, transform_indices = @transform_3, window_bounds = array<i64: 16, 192>}, {pipeline_mode = #tpu.pipeline_mode<synchronous>, transform_indices = @transform_4, window_bounds = array<i64: 1, 192>}, {pipeline_mode = #tpu.pipeline_mode<synchronous>, transform_indices = @transform_5, window_bounds = array<i64: 16, 40>}, {pipeline_mode = #tpu.pipeline_mode<synchronous>, transform_indices = @transform_6, window_bounds = array<i64: 32, 40>}, {pipeline_mode = #tpu.pipeline_mode<synchronous>, transform_indices = @transform_7, window_bounds = array<i64: 32, 40>}, {pipeline_mode = #tpu.pipeline_mode<synchronous>, transform_indices = @transform_8, window_bounds = array<i64: 1, 40>}, {pipeline_mode = #tpu.pipeline_mode<synchronous>, transform_indices = @transform_9, window_bounds = array<i64: 1, 40>}, {transform_indices = @transform_10, window_bounds = array<i64: 1>}, {transform_indices = @transform_11, window_bounds = array<i64: 2, 1>}]} {
    %c0 = arith.constant 0 : index
    %c0_0 = arith.constant 0 : index
    %0 = vector.load %arg1[%c0, %c0_0] : memref<2x18xf32, #tpu.memory_space<vmem>>, vector<2x18xf32>
    %cst = arith.constant 0.000000e+00 : f32
    %1 = vector.broadcast %cst : f32 to vector<2x1xf32>
    %cst_1 = arith.constant 0.000000e+00 : f32
    %2 = vector.broadcast %cst_1 : f32 to vector<2x1xf32>
    %cst_2 = arith.constant 0.000000e+00 : f32
    %3 = vector.broadcast %cst_2 : f32 to vector<2x1xf32>
    %cst_3 = arith.constant 0.000000e+00 : f32
    %4 = vector.broadcast %cst_3 : f32 to vector<2x1xf32>
    %cst_4 = arith.constant 0.000000e+00 : f32
    %5 = vector.broadcast %cst_4 : f32 to vector<2x1xf32>
    %cst_5 = arith.constant 0.000000e+00 : f32
    %6 = vector.broadcast %cst_5 : f32 to vector<2x1xf32>
    %cst_6 = arith.constant 0.000000e+00 : f32
    %7 = vector.broadcast %cst_6 : f32 to vector<2x1xf32>
    %cst_7 = arith.constant 0.000000e+00 : f32
    %8 = vector.broadcast %cst_7 : f32 to vector<2x1xf32>
    %cst_8 = arith.constant 0.000000e+00 : f32
    %9 = vector.broadcast %cst_8 : f32 to vector<2x1xf32>
    %cst_9 = arith.constant 0.000000e+00 : f32
    %10 = vector.broadcast %cst_9 : f32 to vector<2x1xf32>
    %cst_10 = arith.constant 0.000000e+00 : f32
    %11 = vector.broadcast %cst_10 : f32 to vector<2x1xf32>
    %cst_11 = arith.constant 0.000000e+00 : f32
    %12 = vector.broadcast %cst_11 : f32 to vector<2x1xf32>
    %cst_12 = arith.constant 0.000000e+00 : f32
    %13 = vector.broadcast %cst_12 : f32 to vector<2x1xf32>
    %cst_13 = arith.constant 0.000000e+00 : f32
    %14 = vector.broadcast %cst_13 : f32 to vector<2x1xf32>
    %cst_14 = arith.constant 0.000000e+00 : f32
    %15 = vector.broadcast %cst_14 : f32 to vector<2x1xf32>
    %cst_15 = arith.constant 0.000000e+00 : f32
    %16 = vector.broadcast %cst_15 : f32 to vector<2x1xf32>
    %17 = vector.extract_strided_slice %0 {offsets = [0, 0], sizes = [2, 16], strides = [1, 1]} : vector<2x18xf32> to vector<2x16xf32>
    %18 = vector.extract_strided_slice %0 {offsets = [0, 1], sizes = [2, 16], strides = [1, 1]} : vector<2x18xf32> to vector<2x16xf32>
    %19 = vector.extract_strided_slice %0 {offsets = [0, 2], sizes = [2, 16], strides = [1, 1]} : vector<2x18xf32> to vector<2x16xf32>
    %c0_16 = arith.constant 0 : index
    %c0_17 = arith.constant 0 : index
    %20 = memref.load %arg2[%c0_16, %c0_17] : memref<3x16xf32, #tpu.memory_space<smem>>
    %21 = vector.broadcast %20 : f32 to vector<2x16xf32>
    %22 = arith.mulf %17, %21 : vector<2x16xf32>
    %c1 = arith.constant 1 : index
    %c0_18 = arith.constant 0 : index
    %23 = memref.load %arg2[%c1, %c0_18] : memref<3x16xf32, #tpu.memory_space<smem>>
    %24 = vector.broadcast %23 : f32 to vector<2x16xf32>
    %25 = arith.mulf %18, %24 : vector<2x16xf32>
    %26 = arith.addf %22, %25 : vector<2x16xf32>
    %c2 = arith.constant 2 : index
    %c0_19 = arith.constant 0 : index
    %27 = memref.load %arg2[%c2, %c0_19] : memref<3x16xf32, #tpu.memory_space<smem>>
    %28 = vector.broadcast %27 : f32 to vector<2x16xf32>
    %29 = arith.mulf %19, %28 : vector<2x16xf32>
    %30 = arith.addf %26, %29 : vector<2x16xf32>
    %c0_20 = arith.constant 0 : index
    %31 = memref.load %arg3[%c0_20] : memref<16xf32, #tpu.memory_space<smem>>
    %32 = vector.broadcast %31 : f32 to vector<2x16xf32>
    %33 = arith.addf %30, %32 : vector<2x16xf32>
    %cst_21 = arith.constant 0.000000e+00 : f32
    %34 = vector.broadcast %cst_21 : f32 to vector<2x16xf32>
    %35 = arith.maximumf %33, %34 : vector<2x16xf32>
    %cst_22 = arith.constant dense<0.000000e+00> : vector<2xf32>
    %36 = vector.multi_reduction <add>, %35, %cst_22 [1] : vector<2x16xf32> to vector<2xf32>
    %37 = vector.shape_cast %36 : vector<2xf32> to vector<2x1xf32>
    %38 = arith.addf %1, %37 : vector<2x1xf32>
    %c0_23 = arith.constant 0 : index
    %c1_24 = arith.constant 1 : index
    %39 = memref.load %arg2[%c0_23, %c1_24] : memref<3x16xf32, #tpu.memory_space<smem>>
    %40 = vector.broadcast %39 : f32 to vector<2x16xf32>
    %41 = arith.mulf %17, %40 : vector<2x16xf32>
    %c1_25 = arith.constant 1 : index
    %c1_26 = arith.constant 1 : index
    %42 = memref.load %arg2[%c1_25, %c1_26] : memref<3x16xf32, #tpu.memory_space<smem>>
    %43 = vector.broadcast %42 : f32 to vector<2x16xf32>
    %44 = arith.mulf %18, %43 : vector<2x16xf32>
    %45 = arith.addf %41, %44 : vector<2x16xf32>
    %c2_27 = arith.constant 2 : index
    %c1_28 = arith.constant 1 : index
    %46 = memref.load %arg2[%c2_27, %c1_28] : memref<3x16xf32, #tpu.memory_space<smem>>
    %47 = vector.broadcast %46 : f32 to vector<2x16xf32>
    %48 = arith.mulf %19, %47 : vector<2x16xf32>
    %49 = arith.addf %45, %48 : vector<2x16xf32>
    %c1_29 = arith.constant 1 : index
    %50 = memref.load %arg3[%c1_29] : memref<16xf32, #tpu.memory_space<smem>>
    %51 = vector.broadcast %50 : f32 to vector<2x16xf32>
    %52 = arith.addf %49, %51 : vector<2x16xf32>
    %cst_30 = arith.constant 0.000000e+00 : f32
    %53 = vector.broadcast %cst_30 : f32 to vector<2x16xf32>
    %54 = arith.maximumf %52, %53 : vector<2x16xf32>
    %cst_31 = arith.constant dense<0.000000e+00> : vector<2xf32>
    %55 = vector.multi_reduction <add>, %54, %cst_31 [1] : vector<2x16xf32> to vector<2xf32>
    %56 = vector.shape_cast %55 : vector<2xf32> to vector<2x1xf32>
    %57 = arith.addf %2, %56 : vector<2x1xf32>
    %c0_32 = arith.constant 0 : index
    %c2_33 = arith.constant 2 : index
    %58 = memref.load %arg2[%c0_32, %c2_33] : memref<3x16xf32, #tpu.memory_space<smem>>
    %59 = vector.broadcast %58 : f32 to vector<2x16xf32>
    %60 = arith.mulf %17, %59 : vector<2x16xf32>
    %c1_34 = arith.constant 1 : index
    %c2_35 = arith.constant 2 : index
    %61 = memref.load %arg2[%c1_34, %c2_35] : memref<3x16xf32, #tpu.memory_space<smem>>
    %62 = vector.broadcast %61 : f32 to vector<2x16xf32>
    %63 = arith.mulf %18, %62 : vector<2x16xf32>
    %64 = arith.addf %60, %63 : vector<2x16xf32>
    %c2_36 = arith.constant 2 : index
    %c2_37 = arith.constant 2 : index
    %65 = memref.load %arg2[%c2_36, %c2_37] : memref<3x16xf32, #tpu.memory_space<smem>>
    %66 = vector.broadcast %65 : f32 to vector<2x16xf32>
    %67 = arith.mulf %19, %66 : vector<2x16xf32>
    %68 = arith.addf %64, %67 : vector<2x16xf32>
    %c2_38 = arith.constant 2 : index
    %69 = memref.load %arg3[%c2_38] : memref<16xf32, #tpu.memory_space<smem>>
    %70 = vector.broadcast %69 : f32 to vector<2x16xf32>
    %71 = arith.addf %68, %70 : vector<2x16xf32>
    %cst_39 = arith.constant 0.000000e+00 : f32
    %72 = vector.broadcast %cst_39 : f32 to vector<2x16xf32>
    %73 = arith.maximumf %71, %72 : vector<2x16xf32>
    %cst_40 = arith.constant dense<0.000000e+00> : vector<2xf32>
    %74 = vector.multi_reduction <add>, %73, %cst_40 [1] : vector<2x16xf32> to vector<2xf32>
    %75 = vector.shape_cast %74 : vector<2xf32> to vector<2x1xf32>
    %76 = arith.addf %3, %75 : vector<2x1xf32>
    %c0_41 = arith.constant 0 : index
    %c3 = arith.constant 3 : index
    %77 = memref.load %arg2[%c0_41, %c3] : memref<3x16xf32, #tpu.memory_space<smem>>
    %78 = vector.broadcast %77 : f32 to vector<2x16xf32>
    %79 = arith.mulf %17, %78 : vector<2x16xf32>
    %c1_42 = arith.constant 1 : index
    %c3_43 = arith.constant 3 : index
    %80 = memref.load %arg2[%c1_42, %c3_43] : memref<3x16xf32, #tpu.memory_space<smem>>
    %81 = vector.broadcast %80 : f32 to vector<2x16xf32>
    %82 = arith.mulf %18, %81 : vector<2x16xf32>
    %83 = arith.addf %79, %82 : vector<2x16xf32>
    %c2_44 = arith.constant 2 : index
    %c3_45 = arith.constant 3 : index
    %84 = memref.load %arg2[%c2_44, %c3_45] : memref<3x16xf32, #tpu.memory_space<smem>>
    %85 = vector.broadcast %84 : f32 to vector<2x16xf32>
    %86 = arith.mulf %19, %85 : vector<2x16xf32>
    %87 = arith.addf %83, %86 : vector<2x16xf32>
    %c3_46 = arith.constant 3 : index
    %88 = memref.load %arg3[%c3_46] : memref<16xf32, #tpu.memory_space<smem>>
    %89 = vector.broadcast %88 : f32 to vector<2x16xf32>
    %90 = arith.addf %87, %89 : vector<2x16xf32>
    %cst_47 = arith.constant 0.000000e+00 : f32
    %91 = vector.broadcast %cst_47 : f32 to vector<2x16xf32>
    %92 = arith.maximumf %90, %91 : vector<2x16xf32>
    %cst_48 = arith.constant dense<0.000000e+00> : vector<2xf32>
    %93 = vector.multi_reduction <add>, %92, %cst_48 [1] : vector<2x16xf32> to vector<2xf32>
    %94 = vector.shape_cast %93 : vector<2xf32> to vector<2x1xf32>
    %95 = arith.addf %4, %94 : vector<2x1xf32>
    %c0_49 = arith.constant 0 : index
    %c4 = arith.constant 4 : index
    %96 = memref.load %arg2[%c0_49, %c4] : memref<3x16xf32, #tpu.memory_space<smem>>
    %97 = vector.broadcast %96 : f32 to vector<2x16xf32>
    %98 = arith.mulf %17, %97 : vector<2x16xf32>
    %c1_50 = arith.constant 1 : index
    %c4_51 = arith.constant 4 : index
    %99 = memref.load %arg2[%c1_50, %c4_51] : memref<3x16xf32, #tpu.memory_space<smem>>
    %100 = vector.broadcast %99 : f32 to vector<2x16xf32>
    %101 = arith.mulf %18, %100 : vector<2x16xf32>
    %102 = arith.addf %98, %101 : vector<2x16xf32>
    %c2_52 = arith.constant 2 : index
    %c4_53 = arith.constant 4 : index
    %103 = memref.load %arg2[%c2_52, %c4_53] : memref<3x16xf32, #tpu.memory_space<smem>>
    %104 = vector.broadcast %103 : f32 to vector<2x16xf32>
    %105 = arith.mulf %19, %104 : vector<2x16xf32>
    %106 = arith.addf %102, %105 : vector<2x16xf32>
    %c4_54 = arith.constant 4 : index
    %107 = memref.load %arg3[%c4_54] : memref<16xf32, #tpu.memory_space<smem>>
    %108 = vector.broadcast %107 : f32 to vector<2x16xf32>
    %109 = arith.addf %106, %108 : vector<2x16xf32>
    %cst_55 = arith.constant 0.000000e+00 : f32
    %110 = vector.broadcast %cst_55 : f32 to vector<2x16xf32>
    %111 = arith.maximumf %109, %110 : vector<2x16xf32>
    %cst_56 = arith.constant dense<0.000000e+00> : vector<2xf32>
    %112 = vector.multi_reduction <add>, %111, %cst_56 [1] : vector<2x16xf32> to vector<2xf32>
    %113 = vector.shape_cast %112 : vector<2xf32> to vector<2x1xf32>
    %114 = arith.addf %5, %113 : vector<2x1xf32>
    %c0_57 = arith.constant 0 : index
    %c5 = arith.constant 5 : index
    %115 = memref.load %arg2[%c0_57, %c5] : memref<3x16xf32, #tpu.memory_space<smem>>
    %116 = vector.broadcast %115 : f32 to vector<2x16xf32>
    %117 = arith.mulf %17, %116 : vector<2x16xf32>
    %c1_58 = arith.constant 1 : index
    %c5_59 = arith.constant 5 : index
    %118 = memref.load %arg2[%c1_58, %c5_59] : memref<3x16xf32, #tpu.memory_space<smem>>
    %119 = vector.broadcast %118 : f32 to vector<2x16xf32>
    %120 = arith.mulf %18, %119 : vector<2x16xf32>
    %121 = arith.addf %117, %120 : vector<2x16xf32>
    %c2_60 = arith.constant 2 : index
    %c5_61 = arith.constant 5 : index
    %122 = memref.load %arg2[%c2_60, %c5_61] : memref<3x16xf32, #tpu.memory_space<smem>>
    %123 = vector.broadcast %122 : f32 to vector<2x16xf32>
    %124 = arith.mulf %19, %123 : vector<2x16xf32>
    %125 = arith.addf %121, %124 : vector<2x16xf32>
    %c5_62 = arith.constant 5 : index
    %126 = memref.load %arg3[%c5_62] : memref<16xf32, #tpu.memory_space<smem>>
    %127 = vector.broadcast %126 : f32 to vector<2x16xf32>
    %128 = arith.addf %125, %127 : vector<2x16xf32>
    %cst_63 = arith.constant 0.000000e+00 : f32
    %129 = vector.broadcast %cst_63 : f32 to vector<2x16xf32>
    %130 = arith.maximumf %128, %129 : vector<2x16xf32>
    %cst_64 = arith.constant dense<0.000000e+00> : vector<2xf32>
    %131 = vector.multi_reduction <add>, %130, %cst_64 [1] : vector<2x16xf32> to vector<2xf32>
    %132 = vector.shape_cast %131 : vector<2xf32> to vector<2x1xf32>
    %133 = arith.addf %6, %132 : vector<2x1xf32>
    %c0_65 = arith.constant 0 : index
    %c6 = arith.constant 6 : index
    %134 = memref.load %arg2[%c0_65, %c6] : memref<3x16xf32, #tpu.memory_space<smem>>
    %135 = vector.broadcast %134 : f32 to vector<2x16xf32>
    %136 = arith.mulf %17, %135 : vector<2x16xf32>
    %c1_66 = arith.constant 1 : index
    %c6_67 = arith.constant 6 : index
    %137 = memref.load %arg2[%c1_66, %c6_67] : memref<3x16xf32, #tpu.memory_space<smem>>
    %138 = vector.broadcast %137 : f32 to vector<2x16xf32>
    %139 = arith.mulf %18, %138 : vector<2x16xf32>
    %140 = arith.addf %136, %139 : vector<2x16xf32>
    %c2_68 = arith.constant 2 : index
    %c6_69 = arith.constant 6 : index
    %141 = memref.load %arg2[%c2_68, %c6_69] : memref<3x16xf32, #tpu.memory_space<smem>>
    %142 = vector.broadcast %141 : f32 to vector<2x16xf32>
    %143 = arith.mulf %19, %142 : vector<2x16xf32>
    %144 = arith.addf %140, %143 : vector<2x16xf32>
    %c6_70 = arith.constant 6 : index
    %145 = memref.load %arg3[%c6_70] : memref<16xf32, #tpu.memory_space<smem>>
    %146 = vector.broadcast %145 : f32 to vector<2x16xf32>
    %147 = arith.addf %144, %146 : vector<2x16xf32>
    %cst_71 = arith.constant 0.000000e+00 : f32
    %148 = vector.broadcast %cst_71 : f32 to vector<2x16xf32>
    %149 = arith.maximumf %147, %148 : vector<2x16xf32>
    %cst_72 = arith.constant dense<0.000000e+00> : vector<2xf32>
    %150 = vector.multi_reduction <add>, %149, %cst_72 [1] : vector<2x16xf32> to vector<2xf32>
    %151 = vector.shape_cast %150 : vector<2xf32> to vector<2x1xf32>
    %152 = arith.addf %7, %151 : vector<2x1xf32>
    %c0_73 = arith.constant 0 : index
    %c7 = arith.constant 7 : index
    %153 = memref.load %arg2[%c0_73, %c7] : memref<3x16xf32, #tpu.memory_space<smem>>
    %154 = vector.broadcast %153 : f32 to vector<2x16xf32>
    %155 = arith.mulf %17, %154 : vector<2x16xf32>
    %c1_74 = arith.constant 1 : index
    %c7_75 = arith.constant 7 : index
    %156 = memref.load %arg2[%c1_74, %c7_75] : memref<3x16xf32, #tpu.memory_space<smem>>
    %157 = vector.broadcast %156 : f32 to vector<2x16xf32>
    %158 = arith.mulf %18, %157 : vector<2x16xf32>
    %159 = arith.addf %155, %158 : vector<2x16xf32>
    %c2_76 = arith.constant 2 : index
    %c7_77 = arith.constant 7 : index
    %160 = memref.load %arg2[%c2_76, %c7_77] : memref<3x16xf32, #tpu.memory_space<smem>>
    %161 = vector.broadcast %160 : f32 to vector<2x16xf32>
    %162 = arith.mulf %19, %161 : vector<2x16xf32>
    %163 = arith.addf %159, %162 : vector<2x16xf32>
    %c7_78 = arith.constant 7 : index
    %164 = memref.load %arg3[%c7_78] : memref<16xf32, #tpu.memory_space<smem>>
    %165 = vector.broadcast %164 : f32 to vector<2x16xf32>
    %166 = arith.addf %163, %165 : vector<2x16xf32>
    %cst_79 = arith.constant 0.000000e+00 : f32
    %167 = vector.broadcast %cst_79 : f32 to vector<2x16xf32>
    %168 = arith.maximumf %166, %167 : vector<2x16xf32>
    %cst_80 = arith.constant dense<0.000000e+00> : vector<2xf32>
    %169 = vector.multi_reduction <add>, %168, %cst_80 [1] : vector<2x16xf32> to vector<2xf32>
    %170 = vector.shape_cast %169 : vector<2xf32> to vector<2x1xf32>
    %171 = arith.addf %8, %170 : vector<2x1xf32>
    %c0_81 = arith.constant 0 : index
    %c8 = arith.constant 8 : index
    %172 = memref.load %arg2[%c0_81, %c8] : memref<3x16xf32, #tpu.memory_space<smem>>
    %173 = vector.broadcast %172 : f32 to vector<2x16xf32>
    %174 = arith.mulf %17, %173 : vector<2x16xf32>
    %c1_82 = arith.constant 1 : index
    %c8_83 = arith.constant 8 : index
    %175 = memref.load %arg2[%c1_82, %c8_83] : memref<3x16xf32, #tpu.memory_space<smem>>
    %176 = vector.broadcast %175 : f32 to vector<2x16xf32>
    %177 = arith.mulf %18, %176 : vector<2x16xf32>
    %178 = arith.addf %174, %177 : vector<2x16xf32>
    %c2_84 = arith.constant 2 : index
    %c8_85 = arith.constant 8 : index
    %179 = memref.load %arg2[%c2_84, %c8_85] : memref<3x16xf32, #tpu.memory_space<smem>>
    %180 = vector.broadcast %179 : f32 to vector<2x16xf32>
    %181 = arith.mulf %19, %180 : vector<2x16xf32>
    %182 = arith.addf %178, %181 : vector<2x16xf32>
    %c8_86 = arith.constant 8 : index
    %183 = memref.load %arg3[%c8_86] : memref<16xf32, #tpu.memory_space<smem>>
    %184 = vector.broadcast %183 : f32 to vector<2x16xf32>
    %185 = arith.addf %182, %184 : vector<2x16xf32>
    %cst_87 = arith.constant 0.000000e+00 : f32
    %186 = vector.broadcast %cst_87 : f32 to vector<2x16xf32>
    %187 = arith.maximumf %185, %186 : vector<2x16xf32>
    %cst_88 = arith.constant dense<0.000000e+00> : vector<2xf32>
    %188 = vector.multi_reduction <add>, %187, %cst_88 [1] : vector<2x16xf32> to vector<2xf32>
    %189 = vector.shape_cast %188 : vector<2xf32> to vector<2x1xf32>
    %190 = arith.addf %9, %189 : vector<2x1xf32>
    %c0_89 = arith.constant 0 : index
    %c9 = arith.constant 9 : index
    %191 = memref.load %arg2[%c0_89, %c9] : memref<3x16xf32, #tpu.memory_space<smem>>
    %192 = vector.broadcast %191 : f32 to vector<2x16xf32>
    %193 = arith.mulf %17, %192 : vector<2x16xf32>
    %c1_90 = arith.constant 1 : index
    %c9_91 = arith.constant 9 : index
    %194 = memref.load %arg2[%c1_90, %c9_91] : memref<3x16xf32, #tpu.memory_space<smem>>
    %195 = vector.broadcast %194 : f32 to vector<2x16xf32>
    %196 = arith.mulf %18, %195 : vector<2x16xf32>
    %197 = arith.addf %193, %196 : vector<2x16xf32>
    %c2_92 = arith.constant 2 : index
    %c9_93 = arith.constant 9 : index
    %198 = memref.load %arg2[%c2_92, %c9_93] : memref<3x16xf32, #tpu.memory_space<smem>>
    %199 = vector.broadcast %198 : f32 to vector<2x16xf32>
    %200 = arith.mulf %19, %199 : vector<2x16xf32>
    %201 = arith.addf %197, %200 : vector<2x16xf32>
    %c9_94 = arith.constant 9 : index
    %202 = memref.load %arg3[%c9_94] : memref<16xf32, #tpu.memory_space<smem>>
    %203 = vector.broadcast %202 : f32 to vector<2x16xf32>
    %204 = arith.addf %201, %203 : vector<2x16xf32>
    %cst_95 = arith.constant 0.000000e+00 : f32
    %205 = vector.broadcast %cst_95 : f32 to vector<2x16xf32>
    %206 = arith.maximumf %204, %205 : vector<2x16xf32>
    %cst_96 = arith.constant dense<0.000000e+00> : vector<2xf32>
    %207 = vector.multi_reduction <add>, %206, %cst_96 [1] : vector<2x16xf32> to vector<2xf32>
    %208 = vector.shape_cast %207 : vector<2xf32> to vector<2x1xf32>
    %209 = arith.addf %10, %208 : vector<2x1xf32>
    %c0_97 = arith.constant 0 : index
    %c10 = arith.constant 10 : index
    %210 = memref.load %arg2[%c0_97, %c10] : memref<3x16xf32, #tpu.memory_space<smem>>
    %211 = vector.broadcast %210 : f32 to vector<2x16xf32>
    %212 = arith.mulf %17, %211 : vector<2x16xf32>
    %c1_98 = arith.constant 1 : index
    %c10_99 = arith.constant 10 : index
    %213 = memref.load %arg2[%c1_98, %c10_99] : memref<3x16xf32, #tpu.memory_space<smem>>
    %214 = vector.broadcast %213 : f32 to vector<2x16xf32>
    %215 = arith.mulf %18, %214 : vector<2x16xf32>
    %216 = arith.addf %212, %215 : vector<2x16xf32>
    %c2_100 = arith.constant 2 : index
    %c10_101 = arith.constant 10 : index
    %217 = memref.load %arg2[%c2_100, %c10_101] : memref<3x16xf32, #tpu.memory_space<smem>>
    %218 = vector.broadcast %217 : f32 to vector<2x16xf32>
    %219 = arith.mulf %19, %218 : vector<2x16xf32>
    %220 = arith.addf %216, %219 : vector<2x16xf32>
    %c10_102 = arith.constant 10 : index
    %221 = memref.load %arg3[%c10_102] : memref<16xf32, #tpu.memory_space<smem>>
    %222 = vector.broadcast %221 : f32 to vector<2x16xf32>
    %223 = arith.addf %220, %222 : vector<2x16xf32>
    %cst_103 = arith.constant 0.000000e+00 : f32
    %224 = vector.broadcast %cst_103 : f32 to vector<2x16xf32>
    %225 = arith.maximumf %223, %224 : vector<2x16xf32>
    %cst_104 = arith.constant dense<0.000000e+00> : vector<2xf32>
    %226 = vector.multi_reduction <add>, %225, %cst_104 [1] : vector<2x16xf32> to vector<2xf32>
    %227 = vector.shape_cast %226 : vector<2xf32> to vector<2x1xf32>
    %228 = arith.addf %11, %227 : vector<2x1xf32>
    %c0_105 = arith.constant 0 : index
    %c11 = arith.constant 11 : index
    %229 = memref.load %arg2[%c0_105, %c11] : memref<3x16xf32, #tpu.memory_space<smem>>
    %230 = vector.broadcast %229 : f32 to vector<2x16xf32>
    %231 = arith.mulf %17, %230 : vector<2x16xf32>
    %c1_106 = arith.constant 1 : index
    %c11_107 = arith.constant 11 : index
    %232 = memref.load %arg2[%c1_106, %c11_107] : memref<3x16xf32, #tpu.memory_space<smem>>
    %233 = vector.broadcast %232 : f32 to vector<2x16xf32>
    %234 = arith.mulf %18, %233 : vector<2x16xf32>
    %235 = arith.addf %231, %234 : vector<2x16xf32>
    %c2_108 = arith.constant 2 : index
    %c11_109 = arith.constant 11 : index
    %236 = memref.load %arg2[%c2_108, %c11_109] : memref<3x16xf32, #tpu.memory_space<smem>>
    %237 = vector.broadcast %236 : f32 to vector<2x16xf32>
    %238 = arith.mulf %19, %237 : vector<2x16xf32>
    %239 = arith.addf %235, %238 : vector<2x16xf32>
    %c11_110 = arith.constant 11 : index
    %240 = memref.load %arg3[%c11_110] : memref<16xf32, #tpu.memory_space<smem>>
    %241 = vector.broadcast %240 : f32 to vector<2x16xf32>
    %242 = arith.addf %239, %241 : vector<2x16xf32>
    %cst_111 = arith.constant 0.000000e+00 : f32
    %243 = vector.broadcast %cst_111 : f32 to vector<2x16xf32>
    %244 = arith.maximumf %242, %243 : vector<2x16xf32>
    %cst_112 = arith.constant dense<0.000000e+00> : vector<2xf32>
    %245 = vector.multi_reduction <add>, %244, %cst_112 [1] : vector<2x16xf32> to vector<2xf32>
    %246 = vector.shape_cast %245 : vector<2xf32> to vector<2x1xf32>
    %247 = arith.addf %12, %246 : vector<2x1xf32>
    %c0_113 = arith.constant 0 : index
    %c12 = arith.constant 12 : index
    %248 = memref.load %arg2[%c0_113, %c12] : memref<3x16xf32, #tpu.memory_space<smem>>
    %249 = vector.broadcast %248 : f32 to vector<2x16xf32>
    %250 = arith.mulf %17, %249 : vector<2x16xf32>
    %c1_114 = arith.constant 1 : index
    %c12_115 = arith.constant 12 : index
    %251 = memref.load %arg2[%c1_114, %c12_115] : memref<3x16xf32, #tpu.memory_space<smem>>
    %252 = vector.broadcast %251 : f32 to vector<2x16xf32>
    %253 = arith.mulf %18, %252 : vector<2x16xf32>
    %254 = arith.addf %250, %253 : vector<2x16xf32>
    %c2_116 = arith.constant 2 : index
    %c12_117 = arith.constant 12 : index
    %255 = memref.load %arg2[%c2_116, %c12_117] : memref<3x16xf32, #tpu.memory_space<smem>>
    %256 = vector.broadcast %255 : f32 to vector<2x16xf32>
    %257 = arith.mulf %19, %256 : vector<2x16xf32>
    %258 = arith.addf %254, %257 : vector<2x16xf32>
    %c12_118 = arith.constant 12 : index
    %259 = memref.load %arg3[%c12_118] : memref<16xf32, #tpu.memory_space<smem>>
    %260 = vector.broadcast %259 : f32 to vector<2x16xf32>
    %261 = arith.addf %258, %260 : vector<2x16xf32>
    %cst_119 = arith.constant 0.000000e+00 : f32
    %262 = vector.broadcast %cst_119 : f32 to vector<2x16xf32>
    %263 = arith.maximumf %261, %262 : vector<2x16xf32>
    %cst_120 = arith.constant dense<0.000000e+00> : vector<2xf32>
    %264 = vector.multi_reduction <add>, %263, %cst_120 [1] : vector<2x16xf32> to vector<2xf32>
    %265 = vector.shape_cast %264 : vector<2xf32> to vector<2x1xf32>
    %266 = arith.addf %13, %265 : vector<2x1xf32>
    %c0_121 = arith.constant 0 : index
    %c13 = arith.constant 13 : index
    %267 = memref.load %arg2[%c0_121, %c13] : memref<3x16xf32, #tpu.memory_space<smem>>
    %268 = vector.broadcast %267 : f32 to vector<2x16xf32>
    %269 = arith.mulf %17, %268 : vector<2x16xf32>
    %c1_122 = arith.constant 1 : index
    %c13_123 = arith.constant 13 : index
    %270 = memref.load %arg2[%c1_122, %c13_123] : memref<3x16xf32, #tpu.memory_space<smem>>
    %271 = vector.broadcast %270 : f32 to vector<2x16xf32>
    %272 = arith.mulf %18, %271 : vector<2x16xf32>
    %273 = arith.addf %269, %272 : vector<2x16xf32>
    %c2_124 = arith.constant 2 : index
    %c13_125 = arith.constant 13 : index
    %274 = memref.load %arg2[%c2_124, %c13_125] : memref<3x16xf32, #tpu.memory_space<smem>>
    %275 = vector.broadcast %274 : f32 to vector<2x16xf32>
    %276 = arith.mulf %19, %275 : vector<2x16xf32>
    %277 = arith.addf %273, %276 : vector<2x16xf32>
    %c13_126 = arith.constant 13 : index
    %278 = memref.load %arg3[%c13_126] : memref<16xf32, #tpu.memory_space<smem>>
    %279 = vector.broadcast %278 : f32 to vector<2x16xf32>
    %280 = arith.addf %277, %279 : vector<2x16xf32>
    %cst_127 = arith.constant 0.000000e+00 : f32
    %281 = vector.broadcast %cst_127 : f32 to vector<2x16xf32>
    %282 = arith.maximumf %280, %281 : vector<2x16xf32>
    %cst_128 = arith.constant dense<0.000000e+00> : vector<2xf32>
    %283 = vector.multi_reduction <add>, %282, %cst_128 [1] : vector<2x16xf32> to vector<2xf32>
    %284 = vector.shape_cast %283 : vector<2xf32> to vector<2x1xf32>
    %285 = arith.addf %14, %284 : vector<2x1xf32>
    %c0_129 = arith.constant 0 : index
    %c14 = arith.constant 14 : index
    %286 = memref.load %arg2[%c0_129, %c14] : memref<3x16xf32, #tpu.memory_space<smem>>
    %287 = vector.broadcast %286 : f32 to vector<2x16xf32>
    %288 = arith.mulf %17, %287 : vector<2x16xf32>
    %c1_130 = arith.constant 1 : index
    %c14_131 = arith.constant 14 : index
    %289 = memref.load %arg2[%c1_130, %c14_131] : memref<3x16xf32, #tpu.memory_space<smem>>
    %290 = vector.broadcast %289 : f32 to vector<2x16xf32>
    %291 = arith.mulf %18, %290 : vector<2x16xf32>
    %292 = arith.addf %288, %291 : vector<2x16xf32>
    %c2_132 = arith.constant 2 : index
    %c14_133 = arith.constant 14 : index
    %293 = memref.load %arg2[%c2_132, %c14_133] : memref<3x16xf32, #tpu.memory_space<smem>>
    %294 = vector.broadcast %293 : f32 to vector<2x16xf32>
    %295 = arith.mulf %19, %294 : vector<2x16xf32>
    %296 = arith.addf %292, %295 : vector<2x16xf32>
    %c14_134 = arith.constant 14 : index
    %297 = memref.load %arg3[%c14_134] : memref<16xf32, #tpu.memory_space<smem>>
    %298 = vector.broadcast %297 : f32 to vector<2x16xf32>
    %299 = arith.addf %296, %298 : vector<2x16xf32>
    %cst_135 = arith.constant 0.000000e+00 : f32
    %300 = vector.broadcast %cst_135 : f32 to vector<2x16xf32>
    %301 = arith.maximumf %299, %300 : vector<2x16xf32>
    %cst_136 = arith.constant dense<0.000000e+00> : vector<2xf32>
    %302 = vector.multi_reduction <add>, %301, %cst_136 [1] : vector<2x16xf32> to vector<2xf32>
    %303 = vector.shape_cast %302 : vector<2xf32> to vector<2x1xf32>
    %304 = arith.addf %15, %303 : vector<2x1xf32>
    %c0_137 = arith.constant 0 : index
    %c15 = arith.constant 15 : index
    %305 = memref.load %arg2[%c0_137, %c15] : memref<3x16xf32, #tpu.memory_space<smem>>
    %306 = vector.broadcast %305 : f32 to vector<2x16xf32>
    %307 = arith.mulf %17, %306 : vector<2x16xf32>
    %c1_138 = arith.constant 1 : index
    %c15_139 = arith.constant 15 : index
    %308 = memref.load %arg2[%c1_138, %c15_139] : memref<3x16xf32, #tpu.memory_space<smem>>
    %309 = vector.broadcast %308 : f32 to vector<2x16xf32>
    %310 = arith.mulf %18, %309 : vector<2x16xf32>
    %311 = arith.addf %307, %310 : vector<2x16xf32>
    %c2_140 = arith.constant 2 : index
    %c15_141 = arith.constant 15 : index
    %312 = memref.load %arg2[%c2_140, %c15_141] : memref<3x16xf32, #tpu.memory_space<smem>>
    %313 = vector.broadcast %312 : f32 to vector<2x16xf32>
    %314 = arith.mulf %19, %313 : vector<2x16xf32>
    %315 = arith.addf %311, %314 : vector<2x16xf32>
    %c15_142 = arith.constant 15 : index
    %316 = memref.load %arg3[%c15_142] : memref<16xf32, #tpu.memory_space<smem>>
    %317 = vector.broadcast %316 : f32 to vector<2x16xf32>
    %318 = arith.addf %315, %317 : vector<2x16xf32>
    %cst_143 = arith.constant 0.000000e+00 : f32
    %319 = vector.broadcast %cst_143 : f32 to vector<2x16xf32>
    %320 = arith.maximumf %318, %319 : vector<2x16xf32>
    %cst_144 = arith.constant dense<0.000000e+00> : vector<2xf32>
    %321 = vector.multi_reduction <add>, %320, %cst_144 [1] : vector<2x16xf32> to vector<2xf32>
    %322 = vector.shape_cast %321 : vector<2xf32> to vector<2x1xf32>
    %323 = arith.addf %16, %322 : vector<2x1xf32>
    %324 = vector.extract_strided_slice %0 {offsets = [0, 1], sizes = [2, 16], strides = [1, 1]} : vector<2x18xf32> to vector<2x16xf32>
    %c0_145 = arith.constant 0 : index
    %c0_146 = arith.constant 0 : index
    %325 = vector.load %arg4[%c0_145, %c0_146] : memref<16x192xf32, #tpu.memory_space<vmem>>, vector<16x192xf32>
    %cst_147 = arith.constant dense<0.000000e+00> : vector<2x192xf32>
    %326 = tpu.matmul %324, %325, %cst_147 {dimension_numbers = #tpu.dot_dimension_numbers<[1], [0], [0], [1], [0, 0, 1, 1], [], []>} : vector<2x16xf32>, vector<16x192xf32>, vector<2x192xf32> -> vector<2x192xf32>
    %c0_148 = arith.constant 0 : index
    %c0_149 = arith.constant 0 : index
    %327 = vector.load %arg5[%c0_148, %c0_149] : memref<1x192xf32, #tpu.memory_space<vmem>>, vector<1x192xf32>
    %328 = vector.broadcast %327 : vector<1x192xf32> to vector<2x192xf32>
    %329 = arith.addf %326, %328 : vector<2x192xf32>
    %330 = vector.extract_strided_slice %329 {offsets = [0, 0], sizes = [2, 128], strides = [1, 1]} : vector<2x192xf32> to vector<2x128xf32>
    %331 = arith.negf %330 : vector<2x128xf32>
    %332 = math.exp %331 : vector<2x128xf32>
    %cst_150 = arith.constant 1.000000e+00 : f32
    %333 = vector.broadcast %cst_150 : f32 to vector<2x128xf32>
    %334 = arith.addf %333, %332 : vector<2x128xf32>
    %335 = arith.divf %333, %334 : vector<2x128xf32>
    %336 = vector.extract_strided_slice %329 {offsets = [0, 128], sizes = [2, 64], strides = [1, 1]} : vector<2x192xf32> to vector<2x64xf32>
    %337 = math.tanh %336 : vector<2x64xf32>
    %338 = vector.extract_strided_slice %335 {offsets = [0, 32], sizes = [2, 32], strides = [1, 1]} : vector<2x128xf32> to vector<2x32xf32>
    %339 = vector.extract_strided_slice %335 {offsets = [0, 0], sizes = [2, 32], strides = [1, 1]} : vector<2x128xf32> to vector<2x32xf32>
    %340 = vector.extract_strided_slice %337 {offsets = [0, 0], sizes = [2, 32], strides = [1, 1]} : vector<2x64xf32> to vector<2x32xf32>
    %341 = arith.mulf %339, %340 : vector<2x32xf32>
    %342 = math.tanh %341 : vector<2x32xf32>
    %343 = arith.mulf %338, %342 : vector<2x32xf32>
    %344 = vector.extract_strided_slice %335 {offsets = [0, 96], sizes = [2, 32], strides = [1, 1]} : vector<2x128xf32> to vector<2x32xf32>
    %345 = vector.extract_strided_slice %335 {offsets = [0, 64], sizes = [2, 32], strides = [1, 1]} : vector<2x128xf32> to vector<2x32xf32>
    %346 = vector.extract_strided_slice %337 {offsets = [0, 32], sizes = [2, 32], strides = [1, 1]} : vector<2x64xf32> to vector<2x32xf32>
    %347 = arith.mulf %345, %346 : vector<2x32xf32>
    %348 = math.tanh %347 : vector<2x32xf32>
    %349 = arith.mulf %344, %348 : vector<2x32xf32>
    %c0_151 = arith.constant 0 : index
    %c0_152 = arith.constant 0 : index
    %350 = vector.load %arg7[%c0_151, %c0_152] : memref<32x40xf32, #tpu.memory_space<vmem>>, vector<32x40xf32>
    %cst_153 = arith.constant dense<0.000000e+00> : vector<2x40xf32>
    %351 = tpu.matmul %343, %350, %cst_153 {dimension_numbers = #tpu.dot_dimension_numbers<[1], [0], [0], [1], [0, 0, 1, 1], [], []>} : vector<2x32xf32>, vector<32x40xf32>, vector<2x40xf32> -> vector<2x40xf32>
    %c0_154 = arith.constant 0 : index
    %c0_155 = arith.constant 0 : index
    %352 = vector.load %arg8[%c0_154, %c0_155] : memref<32x40xf32, #tpu.memory_space<vmem>>, vector<32x40xf32>
    %cst_156 = arith.constant dense<0.000000e+00> : vector<2x40xf32>
    %353 = tpu.matmul %349, %352, %cst_156 {dimension_numbers = #tpu.dot_dimension_numbers<[1], [0], [0], [1], [0, 0, 1, 1], [], []>} : vector<2x32xf32>, vector<32x40xf32>, vector<2x40xf32> -> vector<2x40xf32>
    %354 = arith.addf %351, %353 : vector<2x40xf32>
    %c0_157 = arith.constant 0 : index
    %c0_158 = arith.constant 0 : index
    %355 = vector.load %arg9[%c0_157, %c0_158] : memref<1x40xf32, #tpu.memory_space<vmem>>, vector<1x40xf32>
    %356 = vector.broadcast %355 : vector<1x40xf32> to vector<2x40xf32>
    %357 = arith.addf %354, %356 : vector<2x40xf32>
    %c0_159 = arith.constant 0 : index
    %c0_160 = arith.constant 0 : index
    %358 = vector.load %arg6[%c0_159, %c0_160] : memref<16x40xf32, #tpu.memory_space<vmem>>, vector<16x40xf32>
    %359 = vector.extract_strided_slice %358 {offsets = [0, 0], sizes = [1, 40], strides = [1, 1]} : vector<16x40xf32> to vector<1x40xf32>
    %360 = vector.broadcast %38 : vector<2x1xf32> to vector<2x40xf32>
    %361 = vector.broadcast %359 : vector<1x40xf32> to vector<2x40xf32>
    %362 = arith.mulf %360, %361 : vector<2x40xf32>
    %363 = arith.addf %357, %362 : vector<2x40xf32>
    %364 = vector.extract_strided_slice %358 {offsets = [1, 0], sizes = [1, 40], strides = [1, 1]} : vector<16x40xf32> to vector<1x40xf32>
    %365 = vector.broadcast %57 : vector<2x1xf32> to vector<2x40xf32>
    %366 = vector.broadcast %364 : vector<1x40xf32> to vector<2x40xf32>
    %367 = arith.mulf %365, %366 : vector<2x40xf32>
    %368 = arith.addf %363, %367 : vector<2x40xf32>
    %369 = vector.extract_strided_slice %358 {offsets = [2, 0], sizes = [1, 40], strides = [1, 1]} : vector<16x40xf32> to vector<1x40xf32>
    %370 = vector.broadcast %76 : vector<2x1xf32> to vector<2x40xf32>
    %371 = vector.broadcast %369 : vector<1x40xf32> to vector<2x40xf32>
    %372 = arith.mulf %370, %371 : vector<2x40xf32>
    %373 = arith.addf %368, %372 : vector<2x40xf32>
    %374 = vector.extract_strided_slice %358 {offsets = [3, 0], sizes = [1, 40], strides = [1, 1]} : vector<16x40xf32> to vector<1x40xf32>
    %375 = vector.broadcast %95 : vector<2x1xf32> to vector<2x40xf32>
    %376 = vector.broadcast %374 : vector<1x40xf32> to vector<2x40xf32>
    %377 = arith.mulf %375, %376 : vector<2x40xf32>
    %378 = arith.addf %373, %377 : vector<2x40xf32>
    %379 = vector.extract_strided_slice %358 {offsets = [4, 0], sizes = [1, 40], strides = [1, 1]} : vector<16x40xf32> to vector<1x40xf32>
    %380 = vector.broadcast %114 : vector<2x1xf32> to vector<2x40xf32>
    %381 = vector.broadcast %379 : vector<1x40xf32> to vector<2x40xf32>
    %382 = arith.mulf %380, %381 : vector<2x40xf32>
    %383 = arith.addf %378, %382 : vector<2x40xf32>
    %384 = vector.extract_strided_slice %358 {offsets = [5, 0], sizes = [1, 40], strides = [1, 1]} : vector<16x40xf32> to vector<1x40xf32>
    %385 = vector.broadcast %133 : vector<2x1xf32> to vector<2x40xf32>
    %386 = vector.broadcast %384 : vector<1x40xf32> to vector<2x40xf32>
    %387 = arith.mulf %385, %386 : vector<2x40xf32>
    %388 = arith.addf %383, %387 : vector<2x40xf32>
    %389 = vector.extract_strided_slice %358 {offsets = [6, 0], sizes = [1, 40], strides = [1, 1]} : vector<16x40xf32> to vector<1x40xf32>
    %390 = vector.broadcast %152 : vector<2x1xf32> to vector<2x40xf32>
    %391 = vector.broadcast %389 : vector<1x40xf32> to vector<2x40xf32>
    %392 = arith.mulf %390, %391 : vector<2x40xf32>
    %393 = arith.addf %388, %392 : vector<2x40xf32>
    %394 = vector.extract_strided_slice %358 {offsets = [7, 0], sizes = [1, 40], strides = [1, 1]} : vector<16x40xf32> to vector<1x40xf32>
    %395 = vector.broadcast %171 : vector<2x1xf32> to vector<2x40xf32>
    %396 = vector.broadcast %394 : vector<1x40xf32> to vector<2x40xf32>
    %397 = arith.mulf %395, %396 : vector<2x40xf32>
    %398 = arith.addf %393, %397 : vector<2x40xf32>
    %399 = vector.extract_strided_slice %358 {offsets = [8, 0], sizes = [1, 40], strides = [1, 1]} : vector<16x40xf32> to vector<1x40xf32>
    %400 = vector.broadcast %190 : vector<2x1xf32> to vector<2x40xf32>
    %401 = vector.broadcast %399 : vector<1x40xf32> to vector<2x40xf32>
    %402 = arith.mulf %400, %401 : vector<2x40xf32>
    %403 = arith.addf %398, %402 : vector<2x40xf32>
    %404 = vector.extract_strided_slice %358 {offsets = [9, 0], sizes = [1, 40], strides = [1, 1]} : vector<16x40xf32> to vector<1x40xf32>
    %405 = vector.broadcast %209 : vector<2x1xf32> to vector<2x40xf32>
    %406 = vector.broadcast %404 : vector<1x40xf32> to vector<2x40xf32>
    %407 = arith.mulf %405, %406 : vector<2x40xf32>
    %408 = arith.addf %403, %407 : vector<2x40xf32>
    %409 = vector.extract_strided_slice %358 {offsets = [10, 0], sizes = [1, 40], strides = [1, 1]} : vector<16x40xf32> to vector<1x40xf32>
    %410 = vector.broadcast %228 : vector<2x1xf32> to vector<2x40xf32>
    %411 = vector.broadcast %409 : vector<1x40xf32> to vector<2x40xf32>
    %412 = arith.mulf %410, %411 : vector<2x40xf32>
    %413 = arith.addf %408, %412 : vector<2x40xf32>
    %414 = vector.extract_strided_slice %358 {offsets = [11, 0], sizes = [1, 40], strides = [1, 1]} : vector<16x40xf32> to vector<1x40xf32>
    %415 = vector.broadcast %247 : vector<2x1xf32> to vector<2x40xf32>
    %416 = vector.broadcast %414 : vector<1x40xf32> to vector<2x40xf32>
    %417 = arith.mulf %415, %416 : vector<2x40xf32>
    %418 = arith.addf %413, %417 : vector<2x40xf32>
    %419 = vector.extract_strided_slice %358 {offsets = [12, 0], sizes = [1, 40], strides = [1, 1]} : vector<16x40xf32> to vector<1x40xf32>
    %420 = vector.broadcast %266 : vector<2x1xf32> to vector<2x40xf32>
    %421 = vector.broadcast %419 : vector<1x40xf32> to vector<2x40xf32>
    %422 = arith.mulf %420, %421 : vector<2x40xf32>
    %423 = arith.addf %418, %422 : vector<2x40xf32>
    %424 = vector.extract_strided_slice %358 {offsets = [13, 0], sizes = [1, 40], strides = [1, 1]} : vector<16x40xf32> to vector<1x40xf32>
    %425 = vector.broadcast %285 : vector<2x1xf32> to vector<2x40xf32>
    %426 = vector.broadcast %424 : vector<1x40xf32> to vector<2x40xf32>
    %427 = arith.mulf %425, %426 : vector<2x40xf32>
    %428 = arith.addf %423, %427 : vector<2x40xf32>
    %429 = vector.extract_strided_slice %358 {offsets = [14, 0], sizes = [1, 40], strides = [1, 1]} : vector<16x40xf32> to vector<1x40xf32>
    %430 = vector.broadcast %304 : vector<2x1xf32> to vector<2x40xf32>
    %431 = vector.broadcast %429 : vector<1x40xf32> to vector<2x40xf32>
    %432 = arith.mulf %430, %431 : vector<2x40xf32>
    %433 = arith.addf %428, %432 : vector<2x40xf32>
    %434 = vector.extract_strided_slice %358 {offsets = [15, 0], sizes = [1, 40], strides = [1, 1]} : vector<16x40xf32> to vector<1x40xf32>
    %435 = vector.broadcast %323 : vector<2x1xf32> to vector<2x40xf32>
    %436 = vector.broadcast %434 : vector<1x40xf32> to vector<2x40xf32>
    %437 = arith.mulf %435, %436 : vector<2x40xf32>
    %438 = arith.addf %433, %437 : vector<2x40xf32>
    %cst_161 = arith.constant 0.000000e+00 : f32
    %439 = vector.broadcast %cst_161 : f32 to vector<2x40xf32>
    %440 = arith.maximumf %438, %439 : vector<2x40xf32>
    %c0_162 = arith.constant 0 : index
    %c0_163 = arith.constant 0 : index
    %441 = vector.load %arg10[%c0_162, %c0_163] : memref<1x40xf32, #tpu.memory_space<vmem>>, vector<1x40xf32>
    %442 = vector.broadcast %441 : vector<1x40xf32> to vector<2x40xf32>
    %443 = arith.mulf %440, %442 : vector<2x40xf32>
    %cst_164 = arith.constant dense<0.000000e+00> : vector<2xf32>
    %444 = vector.multi_reduction <add>, %443, %cst_164 [1] : vector<2x40xf32> to vector<2xf32>
    %445 = vector.shape_cast %444 : vector<2xf32> to vector<2x1xf32>
    %c0_165 = arith.constant 0 : index
    %446 = memref.load %arg11[%c0_165] : memref<1xf32, #tpu.memory_space<smem>>
    %447 = vector.broadcast %446 : f32 to vector<2x1xf32>
    %448 = arith.addf %445, %447 : vector<2x1xf32>
    %c0_166 = arith.constant 0 : index
    %c0_167 = arith.constant 0 : index
    %449 = vector.load %arg12[%c0_166, %c0_167] : memref<2x1xf32, #tpu.memory_space<vmem>>, vector<2x1xf32>
    tpu.vector_store %arg12[%c0_166, %c0_167], %448 {strides = array<i32>} : memref<2x1xf32, #tpu.memory_space<vmem>>, vector<2x1xf32>,
    return
  }
  func.func @transform_0(%arg0: i32) -> (i32, i32) {
    %c0_i32 = arith.constant 0 : i32
    %c0_i32_0 = arith.constant 0 : i32
    return %arg0, %c0_i32 : i32, i32
  }
  func.func @transform_1(%arg0: i32) -> (i32, i32) {
    %c0_i32 = arith.constant 0 : i32
    %c0_i32_0 = arith.constant 0 : i32
    %c0_i32_1 = arith.constant 0 : i32
    return %c0_i32, %c0_i32_0 : i32, i32
  }
  func.func @transform_2(%arg0: i32) -> i32 {
    %c0_i32 = arith.constant 0 : i32
    %c0_i32_0 = arith.constant 0 : i32
    return %c0_i32 : i32
  }
  func.func @transform_3(%arg0: i32) -> (i32, i32) {
    %c0_i32 = arith.constant 0 : i32
    %c0_i32_0 = arith.constant 0 : i32
    %c0_i32_1 = arith.constant 0 : i32
    return %c0_i32, %c0_i32_0 : i32, i32
  }
  func.func @transform_4(%arg0: i32) -> (i32, i32) {
    %c0_i32 = arith.constant 0 : i32
    %c0_i32_0 = arith.constant 0 : i32
    %c0_i32_1 = arith.constant 0 : i32
    return %c0_i32, %c0_i32_0 : i32, i32
  }
  func.func @transform_5(%arg0: i32) -> (i32, i32) {
    %c0_i32 = arith.constant 0 : i32
    %c0_i32_0 = arith.constant 0 : i32
    %c0_i32_1 = arith.constant 0 : i32
    return %c0_i32, %c0_i32_0 : i32, i32
  }
  func.func @transform_6(%arg0: i32) -> (i32, i32) {
    %c0_i32 = arith.constant 0 : i32
    %c0_i32_0 = arith.constant 0 : i32
    %c0_i32_1 = arith.constant 0 : i32
    return %c0_i32, %c0_i32_0 : i32, i32
  }
  func.func @transform_7(%arg0: i32) -> (i32, i32) {
    %c0_i32 = arith.constant 0 : i32
    %c0_i32_0 = arith.constant 0 : i32
    %c0_i32_1 = arith.constant 0 : i32
    return %c0_i32, %c0_i32_0 : i32, i32
  }
  func.func @transform_8(%arg0: i32) -> (i32, i32) {
    %c0_i32 = arith.constant 0 : i32
    %c0_i32_0 = arith.constant 0 : i32
    %c0_i32_1 = arith.constant 0 : i32
    return %c0_i32, %c0_i32_0 : i32, i32
  }
  func.func @transform_9(%arg0: i32) -> (i32, i32) {
    %c0_i32 = arith.constant 0 : i32
    %c0_i32_0 = arith.constant 0 : i32
    %c0_i32_1 = arith.constant 0 : i32
    return %c0_i32, %c0_i32_0 : i32, i32
  }
  func.func @transform_10(%arg0: i32) -> i32 {
    %c0_i32 = arith.constant 0 : i32
    %c0_i32_0 = arith.constant 0 : i32
    return %c0_i32 : i32
  }
  func.func @transform_11(%arg0: i32) -> (i32, i32) {
    %c0_i32 = arith.constant 0 : i32
    %c0_i32_0 = arith.constant 0 : i32
    return %arg0, %c0_i32 : i32, i32
  }
}

</mosaic_0001>

<bundles_post_ra>
// kernel: tpu_custom_call.1
= control target key start
LH: loop header
LB: loop body
LE: loop exit
PB: predicated region body
PF: predicated region fallthrough
CT: control target
= control target key end

     0   :  { %17 = vsyncpa [#allocation4], 0  ;;  %s1314_s0 = inlined_call_operand.hbm [shape: f32[2,18], index: 0, kind: input, shape index: {}]   ;;  %s1315_s1 = inlined_call_operand.hbm [shape: f32[3,16], index: 1, kind: input, shape index: {}]   ;;  %s1316_s2 = inlined_call_operand.vmem [shape: f32[16], index: 2, kind: input, shape index: {}]   ;;  %s1317_s3 = inlined_call_operand.hbm [shape: f32[16,192], index: 3, kind: input, shape index: {}]   ;;  %s1318_s4 = inlined_call_operand.vmem [shape: f32[1,192], index: 4, kind: input, shape index: {}]   ;;  %s1319_s5 = inlined_call_operand.hbm [shape: f32[16,40], index: 5, kind: input, shape index: {}]   ;;  %s1320_s6 = inlined_call_operand.hbm [shape: f32[32,40], index: 6, kind: input, shape index: {}]   ;;  %s1321_s7 = inlined_call_operand.hbm [shape: f32[32,40], index: 7, kind: input, shape index: {}]   ;;  %s1322_s8 = inlined_call_operand.vmem [shape: f32[1,40], index: 8, kind: input, shape index: {}]   ;;  %s1323_s9 = inlined_call_operand.vmem [shape: f32[1,40], index: 9, kind: input, shape index: {}]   ;;  %s1324_s10 = inlined_call_operand.<no memory space> [shape: f32[1], index: 10, kind: input, shape index: {}]   ;;  %s1325_s11 = inlined_call_operand.vmem [shape: f32[2,1], index: 11, kind: output, shape index: {}]  }
   0x1   :  { %18 = vsyncpa [#allocation5], 0 }
   0x2   :  { %19 = vsyncpa [#allocation6], 0 }
   0x3   :  { %20 = vsyncpa [#allocation10], 0  ;;  %s55_s19 = sshll.u32 %s1317_s3, 4  ;;  %s56_s19 = int_to_ptr.hbm [resolvable:$true] %s55_s19 }
   0x4   :  { %21 = vsyncpa [#allocation13], 0  ;;  %s1054_s20 = smov [#allocation9]   ;;  %s1055_s22 = smov 256  }
   0x5   :  { %s57_s21 = sshll.u32 %s1054_s20, 4  ;;  %s1056_s23 = smov 16   ;;  %s58_s21 = int_to_ptr.vmem [resolvable:$true] %s57_s21 }
   0x6   :  { %63 = dma.hbm_to_vmem [thread:$0]  %s56_s19, 512, %s58_s21, [#allocation10], %s1055_s22, %s1055_s22, %s1056_s23  }
   0x7   :  { %s83_s26 = sshll.u32 %s1320_s6, 4  ;;  %s1057_s27 = smov [#allocation12]   ;;  %s84_s26 = int_to_ptr.hbm [resolvable:$true] %s83_s26 }
   0x8   :  { %s85_s28 = sshll.u32 %s1057_s27, 4  ;;  %s27_s12 = sshll.u32 %s1314_s0, 4  ;;  %s86_s28 = int_to_ptr.vmem [resolvable:$true] %s85_s28  ;;  %s28_s12 = int_to_ptr.hbm [resolvable:$true] %s27_s12 }
   0x9   :  { %s1058_s3 = smov 128   ;;  %s1059_s13 = smov 8  }
   0xa   :  { %91 = dma.hbm_to_vmem [thread:$0]  %s84_s26, 512, %s86_s28, [#allocation13], %s1058_s3, %s1058_s3, %s1059_s13  }
   0xb   :  { %s38_s16 = sshll.u32 %s1315_s1, 4  ;;  %s1060_s17 = smov [#allocation3]   ;;  %s39_s16 = int_to_ptr.hbm [resolvable:$true] %s38_s16 }
   0xc   :  { %s29_s18 = sshll.u32 %s1060_s17, 4  ;;  %s1061_s6 = smov [#allocation7]   ;;  %s30_s18 = int_to_ptr.vmem [resolvable:$true] %s29_s18 }
   0xd   :  { %32 = dma.hbm_to_vmem [thread:$0]  %s28_s12, 32, %s30_s18, [#allocation4]  }
   0xe   :  { %41 = dma.hbm_to_smem %s39_s16, 64, %s1061_s6, [#allocation5]  }
   0xf   :  { %s47_s0 = sshll.u32 %s1316_s2, 4  ;;  %s70_s23 = sshll.u32 %s1319_s5, 4  ;;  %s48_s0 = int_to_ptr.vmem [resolvable:$true] %s47_s0  ;;  %s71_s23 = int_to_ptr.hbm [resolvable:$true] %s70_s23 }
  0x10   :  { %s1062_s24 = smov [#allocation8]   ;;  %s1063_s1 = smov [#allocation11]  }
  0x11   :  { %50 = dma.vmem_to_smem %s48_s0, 16, %s1062_s24, [#allocation6]  }
  0x12   :  { %s72_s25 = sshll.u32 %s1063_s1, 4  ;;  %s96_s28 = sshll.u32 %s1321_s7, 4  ;;  %s73_s25 = int_to_ptr.vmem [resolvable:$true] %s72_s25  ;;  %s97_s28 = int_to_ptr.hbm [resolvable:$true] %s96_s28 }
  0x13   :  { %78 = dma.hbm_to_vmem [thread:$0]  %s71_s23, 256, %s73_s25, [#allocation10], %s1058_s3, %s1058_s3, %s1059_s13  }
  0x14   :  { %s1064_s29 = smov [#allocation14]  }
  0x15   :  { %s98_s30 = sshll.u32 %s1064_s29, 4  ;;  %s99_s30 = int_to_ptr.vmem [resolvable:$true] %s98_s30 }
  0x16   :  { %104 = dma.hbm_to_vmem [thread:$0]  %s97_s28, 512, %s99_s30, [#allocation13], %s1058_s3, %s1058_s3, %s1059_s13  }
  0x17   :  { %1044 = dma.done.wait [#allocation4], 32  }
  0x18   :  { %1045 = vsyncadd [#allocation4], 4294967264 }
  0x19   :  { %1046 = dma.done.wait [#allocation5], 64  }
  0x1a   :  { %1047 = vsyncadd [#allocation5], 4294967232 }
  0x1b   :  { %1048 = dma.done.wait [#allocation6], 16  }
  0x1c   :  { %1049 = vsyncadd [#allocation6], 4294967280 }
  0x1d   :  { %1050 = dma.done.wait [#allocation10], 768  }
  0x1e   :  { %1051 = vsyncadd [#allocation10], 4294966528 }
  0x1f   :  { %1052 = dma.done.wait [#allocation13], 1024  }
  0x20   :  { %1053 = vsyncadd [#allocation13], 4294966272 }
  0x21   :  { %139 = sfence }
  0x22   :  { %v1150_v0 = vld [vmem:[#allocation3] sm:$0x3]  ;;  %v576_v1 = vld [vmem:[#allocation9 + $0x10] sm:$0xff]  ;;  %s1065_s2 = smov 127   ;;  %v574_v3 = vld [vmem:[#allocation9] sm:$0xff]  ;;  %s809_s5 = sld [smem:[#allocation7 + $0x81]] }
  0x23   :  { %v577_v2 = vld [vmem:[#allocation9 + $0x18] sm:$0xff]  ;;  %585 = vrot.lane.b32.xlu0 %v1150_v0, %s1065_s2  ;;  %604 = vmatpush.msra.mxu0 %v576_v1  ;;  %v575_v4 = vld [vmem:[#allocation9 + $0x8] sm:$0xff]  ;;  %s807_s7 = sld [smem:[#allocation7 + $0x100]]  ;;  %s1066_s16 = smov 126   ;;  %vm587_vm0 = vcmask 130048   ;;  %vm164_vm1 = vcmask 123904  }
  0x24   :  { %624 = vmatpush.msra.mxu1 %v577_v2  ;;  %s806_s12 = sld [smem:[#allocation7 + $0x80]]  ;;  %v578_v44 = vld [vmem:[%s1318_s4] sm:$0x3]  ;;  %s1067_s27 = smov 32   ;;  %vm679_vm6 = vcmask 261120   ;;  %vm788_vm7 = vcmask 320512  }
  0x25   :  { %605 = vmatpush.msra.mxu0 %v574_v3  ;;  %s810_s3 = sld [smem:[#allocation7 + $0x101]]  ;;  %v580_v45 = vperm.slane %v578_v44, 0  ;;  %v581_v46 = vperm.slane %v578_v44, 1  ;;  %vm795_vm8 = vcmask 1024  }
  0x26   :  { %625 = vmatpush.msra.mxu1 %v575_v4  ;;  %s817_s13 = sld [smem:[#allocation7 + $0x83]] }
  0x27   :  { %s821_s14 = sld [smem:[#allocation7 + $0x84]] }
  0x28   :  { %v173_v5 = vstv %s809_s5  ;;  %s813_s15 = sld [smem:[#allocation7 + $0x82]] }
  0x29   :  { %v174_v6 = vmul.f32 %v173_v5, %v1150_v0  ;;  %v153_v7 = vstv %s807_s7  ;;  %s814_s17 = sld [smem:[#allocation7 + $0x102]] }
  0x2a   :  { %v154_v8 = vmul.f32 %v153_v7, %v1150_v0  ;;  %v145_v9 = vstv %s806_s12  ;;  %s818_s18 = sld [smem:[#allocation7 + $0x103]] }
  0x2b   :  { %176 = vrot.lane.b32.xlu2 %v174_v6, %s1065_s2  ;;  %v181_v10 = vstv %s810_s3  ;;  %v146_v11 = vmul.f32 %v145_v9, %v1150_v0  ;;  %s808_s6 = sld [smem:[#allocation7 + $0x1]] }
  0x2c   :  { %156 = vrot.lane.b32.xlu1 %v154_v8, %s1066_s16  ;;  %v227_v12 = vstv %s817_s13  ;;  %v182_v13 = vmul.f32 %v181_v10, %v1150_v0  ;;  %s811_s19 = sld [smem:[#allocation8 + $0x1]] }
  0x2d   :  { %148 = vrot.lane.b32.xlu0 %v146_v11, %s1065_s2  ;;  %v254_v14 = vstv %s821_s14  ;;  %v228_v15 = vmul.f32 %v227_v12, %v1150_v0  ;;  %s812_s20 = sld [smem:[#allocation7 + $0x2]]  ;;  %s1068_s14 = smov 96  }
  0x2e   :  { %v255_v16 = vmul.f32 %v254_v14, %v1150_v0  ;;  %v200_v17 = vstv %s813_s15  ;;  %s815_s0 = sld [smem:[#allocation8 + $0x2]] }
  0x2f   :  { %v201_v18 = vmul.f32 %v200_v17, %v1150_v0  ;;  %v208_v19 = vstv %s814_s17  ;;  %s825_s21 = sld [smem:[#allocation7 + $0x85]] }
  0x30   :  { %v209_v20 = vmul.f32 %v208_v19, %v1150_v0  ;;  %v235_v21 = vstv %s818_s18  ;;  %s141_s22 = sld [smem:[#allocation7]] }
  0x31   :  { %v236_v22 = vmul.f32 %v235_v21, %v1150_v0  ;;  %v170_v24 = vstv %s808_s6  ;;  %s160_s1 = sld [smem:[#allocation8]] }
  0x32   :  { %v171_v26 = vmul.f32 %v170_v24, %v1150_v0  ;;  %v189_v28 = vstv %s811_s19  ;;  %s816_s25 = sld [smem:[#allocation7 + $0x3]] }
  0x33   :  { %184 = vrot.lane.b32.xlu2 %v182_v13, %s1066_s16  ;;  %v197_v33 = vstv %s812_s20  ;;  %s822_s4 = sld [smem:[#allocation7 + $0x104]] }
  0x34   :  { %230 = vrot.lane.b32.xlu1 %v228_v15, %s1065_s2  ;;  %v198_v36 = vmul.f32 %v197_v33, %v1150_v0  ;;  %v216_v38 = vstv %s815_s0  ;;  %s819_s26 = sld [smem:[#allocation8 + $0x3]] }
  0x35   :  { %257 = vrot.lane.b32.xlu0 %v255_v16, %s1065_s2  ;;  %v281_v47 = vstv %s825_s21  ;;  %s826_s28 = sld [smem:[#allocation7 + $0x105]] }
  0x36   :  { %v282_v48 = vmul.f32 %v281_v47, %v1150_v0  ;;  %v142_v49 = vstv %s141_s22  ;;  %s820_s29 = sld [smem:[#allocation7 + $0x4]] }
  0x37   :  { %v143_v52 = vmul.f32 %v142_v49, %v1150_v0  ;;  %v161_v60 = vstv %s160_s1  ;;  %s830_s30 = sld [smem:[#allocation7 + $0x106]] }
  0x38   :  { %v224_v62 = vstv %s816_s25  ;;  %s823_s5 = sld [smem:[#allocation8 + $0x4]] }
  0x39   :  { %v225_v63 = vmul.f32 %v224_v62, %v1150_v0  ;;  %v262_v8 = vstv %s822_s4  ;;  %s824_s7 = sld [smem:[#allocation7 + $0x5]] }
  0x3a   :  { %v243_v10 = vstv %s819_s26  ;;  %v263_v12 = vmul.f32 %v262_v8, %v1150_v0  ;;  %s829_s12 = sld [smem:[#allocation7 + $0x86]]  ;;  %v671_v8 = vld [vmem:[#allocation12 + $0x18] sm:$0xff] }
  0x3b   :  { %203 = vrot.lane.b32.xlu2 %v201_v18, %s1065_s2  ;;  %s834_s3 = sld [smem:[#allocation7 + $0x107]]  ;;  %719 = vmatpush.msra.mxu3 %v671_v8 }
  0x3c   :  { %s827_s13 = sld [smem:[#allocation8 + $0x5]] }
  0x3d   :  { %s833_s15 = sld [smem:[#allocation7 + $0x87]] }
  0x3e   :  { %s837_s17 = sld [smem:[#allocation7 + $0x88]] }
  0x3f   :  { %s838_s18 = sld [smem:[#allocation7 + $0x108]] }
  0x40   :  { %s828_s6 = sld [smem:[#allocation7 + $0x6]] }
  0x41   :  { %s831_s19 = sld [smem:[#allocation8 + $0x6]] }
  0x42   :  { %s832_s20 = sld [smem:[#allocation7 + $0x7]] }
  0x43   :  { %211 = vrot.lane.b32.xlu2 %v209_v20, %s1066_s16  ;;  %s835_s0 = sld [smem:[#allocation8 + $0x7]] }
  0x44   :  { %s836_s21 = sld [smem:[#allocation7 + $0x8]] }
  0x45   :  { %s839_s22 = sld [smem:[#allocation8 + $0x8]] }
  0x46   :  { %s845_s23 = sld [smem:[#allocation7 + $0x8a]] }
  0x47   :  { %s841_s24 = sld [smem:[#allocation7 + $0x89]] }
  0x48   :  { %s842_s1 = sld [smem:[#allocation7 + $0x109]] }
  0x49   :  { %s846_s25 = sld [smem:[#allocation7 + $0x10a]] }
  0x4a   :  { %s849_s4 = sld [smem:[#allocation7 + $0x8b]] }
  0x4b   :  { %238 = vrot.lane.b32.xlu2 %v236_v22, %s1066_s16  ;;  %s850_s26 = sld [smem:[#allocation7 + $0x10b]] }
  0x85   :  { %v177_v25 = vpop.permute.xlu2 %176 }
  0x86   :  { %v179_v27 = vadd.f32 %v177_v25, %v171_v26 }
  0x8d   :  { %v185_v29 = vpop.permute.xlu2 %184 }
  0x8e   :  { %v187_v30 = vadd.f32 %v185_v29, %v179_v27  ;;  %v289_v27 = vstv %s826_s28  ;;  %s857_s28 = sld [smem:[#allocation7 + $0x8d]] }
  0x8f   :  { %v290_v29 = vmul.f32 %v289_v27, %v1150_v0 }
  0x90   :  { %v190_v31 = vadd.f32 %v189_v28, %v187_v30 }
  0x92   :  { %v191_v32 = vmax.f32 %v190_v31, 0.0 }
  0x94   :  { %v192_v34 = vsel %vm164_vm1, %v191_v32, 0.0  ;;  %v251_v32 = vstv %s820_s29  ;;  %s858_s29 = sld [smem:[#allocation7 + $0x10d]] }
  0x95   :  { %v586_v23 = vpop.permute.xlu0 %585  ;;  %v204_v35 = vpop.permute.xlu2 %203  ;;  %193 = vadd.xlane.f32.xlu0 %v192_v34 }
  0x96   :  { %868 = vmatmul.msk.f32.vlgmr.msra.gmra.mxu0 %vm587_vm0, %v586_v23  ;;  %869 = vmatmul.msk.f32.vlgmr.msra.gmra.mxu1 %vm587_vm0, %v586_v23  ;;  %v206_v37 = vadd.f32 %v204_v35, %v198_v36  ;;  %v252_v35 = vmul.f32 %v251_v32, %v1150_v0  ;;  %v316_v36 = vstv %s830_s30  ;;  %s865_s30 = sld [smem:[#allocation7 + $0x8f]] }
  0x9d   :  { %v212_v39 = vpop.permute.xlu2 %211 }
  0x9e   :  { %v214_v40 = vadd.f32 %v212_v39, %v206_v37  ;;  %v157_v55 = vpop.permute.xlu1 %156  ;;  %v317_v37 = vmul.f32 %v316_v36, %v1150_v0  ;;  %v270_v39 = vstv %s823_s5  ;;  %s840_s5 = sld [smem:[#allocation7 + $0x9]] }
  0x9f   :  { %v149_v56 = vpop.permute.xlu0 %148 }
  0xa0   :  { %v217_v41 = vadd.f32 %v216_v38, %v214_v40  ;;  %v151_v57 = vadd.f32 %v149_v56, %v143_v52 }
  0xa2   :  { %v218_v42 = vmax.f32 %v217_v41, 0.0  ;;  %v159_v59 = vadd.f32 %v157_v55, %v151_v57  ;;  %v343_v57 = vstv %s834_s3  ;;  %s847_s3 = sld [smem:[#allocation8 + $0xa]] }
  0xa4   :  { %v219_v43 = vsel %vm164_vm1, %v218_v42, 0.0  ;;  %v162_v61 = vadd.f32 %v161_v60, %v159_v59  ;;  %v344_v59 = vmul.f32 %v343_v57, %v1150_v0  ;;  %v397_v57 = vstv %s842_s1 }
  0xa5   :  { %220 = vadd.xlane.f32.xlu2 %v219_v43  ;;  %v239_v4 = vpop.permute.xlu2 %238 }
  0xa6   :  { %v163_v1 = vmax.f32 %v162_v61, 0.0  ;;  %v231_v3 = vpop.permute.xlu1 %230 }
  0xa7   :  { %v233_v5 = vadd.f32 %v231_v3, %v225_v63  ;;  %v258_v30 = vpop.permute.xlu0 %257 }
  0xa8   :  { %v165_v6 = vsel %vm164_vm1, %v163_v1, 0.0  ;;  %v260_v38 = vadd.f32 %v258_v30, %v252_v35 }
  0xa9   :  { %166 = vadd.xlane.f32.xlu1 %v165_v6  ;;  %v241_v11 = vadd.f32 %v239_v4, %v233_v5  ;;  %v362_v4 = vstv %s837_s17  ;;  %v370_v6 = vstv %s838_s18  ;;  %s862_s17 = sld [smem:[#allocation7 + $0x10e]] }
  0xaa   :  { %v363_v5 = vmul.f32 %v362_v4, %v1150_v0  ;;  %s861_s18 = sld [smem:[#allocation7 + $0x8e]] }
  0xab   :  { %v244_v13 = vadd.f32 %v243_v10, %v241_v11  ;;  %v669_v10 = vld [vmem:[#allocation12 + $0x8] sm:$0xff]  ;;  %v668_v11 = vld [vmem:[#allocation12] sm:$0xff] }
  0xad   :  { %v245_v14 = vmax.f32 %v244_v13, 0.0  ;;  %v305_v13 = vstv %s828_s6  ;;  %s866_s6 = sld [smem:[#allocation7 + $0x10f]] }
  0xaf   :  { %v246_v15 = vsel %vm164_vm1, %v245_v14, 0.0  ;;  %v306_v14 = vmul.f32 %v305_v13, %v1150_v0  ;;  %v551_v13 = vstv %s865_s30 }
  0xb1   :  { %247 = vadd.xlane.f32.xlu1 %v246_v15 }
  0xbd   :  { %284 = vrot.lane.b32.xlu2 %v282_v48, %s1065_s2  ;;  %v278_v48 = vstv %s824_s7  ;;  %s844_s7 = sld [smem:[#allocation7 + $0xa]] }
  0xca   :  { %292 = vrot.lane.b32.xlu1 %v290_v29, %s1066_s16 }
  0xd2   :  { %319 = vrot.lane.b32.xlu1 %v317_v37, %s1066_s16 }
 0x108   :  { %v1194_v31 = vpop.xlane.xlu0 %193 }
 0x113   :  { %v607_v50 = vpop.f32.mrf.mxu0  ;;  %v627_v51 = vpop.f32.mrf.mxu1 }
 0x114   :  { %v608_v53 = vadd.f32 %v607_v50, %v580_v45  ;;  %v628_v54 = vadd.f32 %v627_v51, %v581_v46  ;;  %v279_v50 = vmul.f32 %v278_v48, %v1150_v0  ;;  %v308_v51 = vstv %s829_s12  ;;  %s843_s12 = sld [smem:[#allocation8 + $0x9]] }
 0x116   :  { %v870_v58 = vmul.f32 -1.442695, %v608_v53  ;;  %890 = vtanh.f32 %v628_v54  ;;  %v309_v54 = vmul.f32 %v308_v51, %v1150_v0 }
 0x118   :  { %892 = vpow2.f32 %v870_v58  ;;  %v1204_v47 = vpop.xlane.xlu2 %220  ;;  %v297_v58 = vstv %s827_s13  ;;  %s848_s13 = sld [smem:[#allocation7 + $0xb]] }
 0x11c   :  { %v891_v2 = vpop.eup %890  ;;  %v1202_v46 = vpop.xlane.xlu1 %166 }
 0x11d   :  { %658 = vrot.lane.b32.xlu0 %v891_v2, %s1067_s27 }
 0x11e   :  { %v893_v7 = vpop.eup %892 }
 0x11f   :  { %v633_v9 = vadd.f32 1.0, %v893_v7  ;;  %v371_v7 = vmul.f32 %v370_v6, %v1150_v0  ;;  %v497_v6 = vstv %s857_s28 }
 0x120   :  { %v285_v52 = vpop.permute.xlu2 %284 }
 0x121   :  { %894 = vrcp.f32 %v633_v9  ;;  %v645_v19 = vand.u32 2147483648, %v633_v9  ;;  %v643_v21 = vand.u32 2147483647, %v633_v9  ;;  %vm639_vm3 = vweird.f32 %v633_v9 }
 0x122   :  { %v287_v53 = vadd.f32 %v285_v52, %v279_v50  ;;  %v416_v50 = vstv %s845_s23  ;;  %s867_s23 = sld [smem:[#allocation8 + $0xf]] }
 0x123   :  { %v646_v23 = vor.u32 1.1754944e-38, %v645_v19  ;;  %vm644_vm5 = vcmp.eq.f32.partialorder %v643_v21, 8.507059e+37 }
 0x124   :  { %v1206_v49 = vpop.xlane.xlu1 %247 }
 0x125   :  { %265 = vrot.lane.b32.xlu0 %v263_v12, %s1066_s16 }
 0x127   :  { %v895_v16 = vpop.eup %894 }
 0x128   :  { %v635_v17 = vmul.f32 %v895_v16, %v633_v9  ;;  %vm640_vm2 = vweird.f32 %v895_v16  ;;  %v670_v9 = vld [vmem:[#allocation12 + $0x10] sm:$0xff] }
 0x129   :  { %vm641_vm4 = vmor %vm639_vm3, %vm640_vm2  ;;  %720 = vmatpush.msra.mxu3 %v670_v9 }
 0x12a   :  { %v636_v18 = vsub.f32 1.0, %v635_v17 }
 0x12b   :  { %721 = vmatpush.msra.mxu3 %v669_v10  ;;  %v505_v10 = vstv %s858_s29 }
 0x12c   :  { %v637_v20 = vmul.f32 %v895_v16, %v636_v18  ;;  %v324_v18 = vstv %s831_s19 }
 0x12d   :  { %722 = vmatpush.msra.mxu3 %v668_v11  ;;  %v506_v11 = vmul.f32 %v505_v10, %v1150_v0 }
 0x12e   :  { %v638_v22 = vadd.f32 %v895_v16, %v637_v20 }
 0x130   :  { %v642_v24 = vsel %vm641_vm4, %v895_v16, %v638_v22 }
 0x131   :  { %v1188_v25 = vsel %vm644_vm5, %v646_v23, %v642_v24 }
 0x132   :  { %v650_v26 = vmul.f32 %v891_v2, %v1188_v25  ;;  %v335_v2 = vstv %s833_s15  ;;  %s853_s15 = sld [smem:[#allocation7 + $0x8c]] }
 0x133   :  { %v336_v3 = vmul.f32 %v335_v2, %v1150_v0  ;;  %v451_v2 = vstv %s850_s26 }
 0x134   :  { %896 = vtanh.f32 %v650_v26 }
 0x13a   :  { %v897_v28 = vpop.eup %896 }
 0x13b   :  { %653 = vrot.lane.b32.xlu2 %v897_v28, %s1067_s27  ;;  %v332_v28 = vstv %s832_s20 }
 0x13c   :  { %v293_v55 = vpop.permute.xlu1 %292  ;;  %v333_v29 = vmul.f32 %v332_v28, %v1150_v0 }
 0x13d   :  { %v295_v56 = vadd.f32 %v293_v55, %v287_v53  ;;  %v389_v53 = vstv %s841_s24  ;;  %v675_v55 = vld [vmem:[#allocation14 + $0x18] sm:$0xff]  ;;  %s863_s24 = sld [smem:[#allocation8 + $0xe]] }
 0x13e   :  { %694 = vmatpush.msra.mxu2 %v675_v55 }
 0x13f   :  { %v298_v60 = vadd.f32 %v297_v58, %v295_v56  ;;  %v674_v56 = vld [vmem:[#allocation14 + $0x10] sm:$0xff]  ;;  %v673_v58 = vld [vmem:[#allocation14 + $0x8] sm:$0xff] }
 0x140   :  { %695 = vmatpush.msra.mxu2 %v674_v56  ;;  %v524_v56 = vstv %s861_s18 }
 0x141   :  { %v299_v61 = vmax.f32 %v298_v60, 0.0  ;;  %v424_v60 = vstv %s846_s25 }
 0x142   :  { %696 = vmatpush.msra.mxu2 %v673_v58  ;;  %v559_v58 = vstv %s866_s6 }
 0x143   :  { %v300_v63 = vsel %vm164_vm1, %v299_v61, 0.0  ;;  %v425_v61 = vmul.f32 %v424_v60, %v1150_v0  ;;  %v732_v60 = vld [vmem:[#allocation11] sm:$0xff] }
 0x144   :  { %v320_v16 = vpop.permute.xlu1 %319 }
 0x18f   :  { %v659_v33 = vpop.permute.xlu0 %658 }
 0x190   :  { %v661_v34 = vmul.f32 %v659_v33, %v1188_v25  ;;  %v351_v33 = vstv %s835_s0  ;;  %s855_s0 = sld [smem:[#allocation8 + $0xc]] }
 0x192   :  { %898 = vtanh.f32 %v661_v34 }
 0x195   :  { %v654_v62 = vpop.permute.xlu2 %653 }
 0x196   :  { %v656_v1 = vmul.f32 %v654_v62, %v1188_v25  ;;  %v443_v62 = vstv %s849_s4 }
 0x197   :  { %v266_v40 = vpop.permute.xlu0 %265 }
 0x198   :  { %v899_v41 = vpop.eup %898  ;;  %v268_v42 = vadd.f32 %v266_v40, %v260_v38  ;;  %v359_v40 = vstv %s836_s21  ;;  %s864_s21 = sld [smem:[#allocation7 + $0xf]] }
 0x199   :  { %664 = vrot.lane.b32.xlu2 %v899_v41, %s1067_s27  ;;  %v360_v41 = vmul.f32 %v359_v40, %v1150_v0 }
 0x19a   :  { %v271_v43 = vadd.f32 %v270_v39, %v268_v42 }
 0x19c   :  { %v272_v44 = vmax.f32 %v271_v43, 0.0 }
 0x19e   :  { %v273_v45 = vsel %vm164_vm1, %v272_v44, 0.0 }
 0x19f   :  { %274 = vadd.xlane.f32.xlu0 %v273_v45  ;;  %v378_v45 = vstv %s839_s22  ;;  %s860_s22 = sld [smem:[#allocation7 + $0xe]] }
 0x1b3   :  { %311 = vrot.lane.b32.xlu0 %v309_v54, %s1065_s2  ;;  %v390_v54 = vmul.f32 %v389_v53, %v1150_v0  ;;  %v532_v53 = vstv %s862_s17 }
 0x1b4   :  { %v533_v55 = vmul.f32 %v532_v53, %v1150_v0  ;;  %v486_v53 = vstv %s855_s0 }
 0x1bb   :  { %346 = vrot.lane.b32.xlu0 %v344_v59, %s1066_s16  ;;  %v398_v59 = vmul.f32 %v397_v57, %v1150_v0  ;;  %v525_v57 = vmul.f32 %v524_v56, %v1150_v0 }
 0x1c2   :  { %301 = vadd.xlane.f32.xlu2 %v300_v63  ;;  %v444_v63 = vmul.f32 %v443_v62, %v1150_v0  ;;  %v888_v62 = vld [vmem:[%s1322_s8] ss:$0 sm:$0xff]  ;;  %s856_s8 = sld [smem:[#allocation7 + $0xd]] }
 0x1c3   :  { %703 = vrot.lane.b32.xlu0 %v656_v1, %s1068_s14  ;;  %v672_v1 = vld [vmem:[#allocation14] sm:$0xff]  ;;  %s851_s14 = sld [smem:[#allocation8 + $0xb]] }
 0x1c4   :  { %697 = vmatpush.msra.mxu2 %v672_v1 }
 0x1da   :  { %338 = vrot.lane.b32.xlu2 %v336_v3, %s1065_s2  ;;  %v452_v3 = vmul.f32 %v451_v2, %v1150_v0  ;;  %v737_v2 = vperm.slane %v732_v60, 1 }
 0x1e2   :  { %365 = vrot.lane.b32.xlu2 %v363_v5, %s1065_s2 }
 0x1ea   :  { %373 = vrot.lane.b32.xlu2 %v371_v7, %s1066_s16  ;;  %v498_v7 = vmul.f32 %v497_v6, %v1150_v0 }
 0x1f2   :  { %392 = vrot.lane.b32.xlu2 %v390_v54, %s1065_s2 }
 0x1f3   :  { %v665_v22 = vpop.permute.xlu2 %664 }
 0x1f4   :  { %v667_v37 = vmul.f32 %v665_v22, %v1188_v25  ;;  %v417_v25 = vmul.f32 %v416_v50, %v1150_v0  ;;  %v405_v22 = vstv %s843_s12  ;;  %v470_v50 = vstv %s853_s15 }
 0x212   :  { %v1221_v12 = vpop.xlane.xlu0 %274 }
 0x225   :  { %v312_v15 = vpop.permute.xlu0 %311 }
 0x226   :  { %v314_v17 = vadd.f32 %v312_v15, %v306_v14  ;;  %v552_v14 = vmul.f32 %v551_v13, %v1150_v0  ;;  %v386_v15 = vstv %s840_s5  ;;  %v746_v13 = vperm.slane %v732_v60, 4 }
 0x228   :  { %v322_v19 = vadd.f32 %v320_v16, %v314_v17  ;;  %v387_v17 = vmul.f32 %v386_v15, %v1150_v0 }
 0x22a   :  { %v325_v20 = vadd.f32 %v324_v18, %v322_v19 }
 0x22c   :  { %v326_v21 = vmax.f32 %v325_v20, 0.0 }
 0x22d   :  { %v347_v23 = vpop.permute.xlu0 %346 }
 0x22e   :  { %v327_v24 = vsel %vm164_vm1, %v326_v21, 0.0  ;;  %v413_v21 = vstv %s844_s7 }
 0x22f   :  { %328 = vadd.xlane.f32.xlu1 %v327_v24 }
 0x235   :  { %v704_v26 = vpop.permute.xlu0 %703  ;;  %v1225_v27 = vpop.xlane.xlu2 %301 }
 0x236   :  { %872 = vmatmul.msk.f32.vlgmr.msra.gmra.mxu3 %vm679_vm6, %v704_v26  ;;  %v414_v26 = vmul.f32 %v413_v21, %v1150_v0  ;;  %v752_v21 = vperm.slane %v732_v60, 6 }
 0x23d   :  { %v339_v30 = vpop.permute.xlu2 %338 }
 0x23e   :  { %v341_v32 = vadd.f32 %v339_v30, %v333_v29 }
 0x240   :  { %v349_v34 = vadd.f32 %v347_v23, %v341_v32 }
 0x242   :  { %v352_v35 = vadd.f32 %v351_v33, %v349_v34  ;;  %v432_v34 = vstv %s847_s3 }
 0x244   :  { %v353_v36 = vmax.f32 %v352_v35, 0.0 }
 0x245   :  { %v366_v39 = vpop.permute.xlu2 %365 }
 0x246   :  { %v354_v38 = vsel %vm164_vm1, %v353_v36, 0.0  ;;  %v368_v42 = vadd.f32 %v366_v39, %v360_v41  ;;  %v440_v39 = vstv %s848_s13 }
 0x247   :  { %355 = vadd.xlane.f32.xlu0 %v354_v38 }
 0x248   :  { %677 = vrot.lane.b32.xlu1 %v667_v37, %s1067_s27  ;;  %s854_s27 = sld [smem:[#allocation7 + $0x10c]] }
 0x24d   :  { %v374_v43 = vpop.permute.xlu2 %373 }
 0x24e   :  { %v376_v44 = vadd.f32 %v374_v43, %v368_v42  ;;  %v478_v4 = vstv %s854_s27  ;;  %v441_v42 = vmul.f32 %v440_v39, %v1150_v0 }
 0x24f   :  { %v479_v5 = vmul.f32 %v478_v4, %v1150_v0  ;;  %v740_v4 = vperm.slane %v732_v60, 2 }
 0x250   :  { %v379_v48 = vadd.f32 %v378_v45, %v376_v44  ;;  %v459_v44 = vstv %s851_s14 }
 0x252   :  { %v380_v51 = vmax.f32 %v379_v48, 0.0 }
 0x254   :  { %v381_v52 = vsel %vm164_vm1, %v380_v51, 0.0  ;;  %v471_v51 = vmul.f32 %v470_v50, %v1150_v0 }
 0x255   :  { %v393_v19 = vpop.permute.xlu2 %392 }
 0x256   :  { %v395_v20 = vadd.f32 %v393_v19, %v387_v17  ;;  %v749_v17 = vperm.slane %v732_v60, 5 }
 0x25b   :  { %419 = vrot.lane.b32.xlu0 %v417_v25, %s1065_s2 }
 0x272   :  { %382 = vadd.xlane.f32.xlu1 %v381_v52 }
 0x28b   :  { %400 = vrot.lane.b32.xlu1 %v398_v59, %s1066_s16  ;;  %v560_v59 = vmul.f32 %v559_v58, %v1150_v0 }
 0x293   :  { %427 = vrot.lane.b32.xlu1 %v425_v61, %s1066_s16  ;;  %v734_v61 = vperm.slane %v732_v60, 0 }
 0x29b   :  { %446 = vrot.lane.b32.xlu1 %v444_v63, %s1065_s2 }
 0x2a2   :  { %v1249_v8 = vpop.xlane.xlu1 %328 }
 0x2a3   :  { %454 = vrot.lane.b32.xlu1 %v452_v3, %s1066_s16 }
 0x2ab   :  { %481 = vrot.lane.b32.xlu1 %v479_v5, %s1066_s16  ;;  %v735_v5 = vmul.f32 %v734_v61, %v1202_v46  ;;  %v750_v46 = vmul.f32 %v749_v17, %v1225_v27 }
 0x2b3   :  { %500 = vrot.lane.b32.xlu1 %v498_v7, %s1065_s2  ;;  %v738_v7 = vmul.f32 %v737_v2, %v1194_v31 }
 0x2b9   :  { %v724_v63 = vpop.f32.mrf.mxu3 }
 0x2ba   :  { %v678_v9 = vpop.permute.xlu1 %677  ;;  %v1260_v18 = vpop.xlane.xlu0 %355 }
 0x2bb   :  { %871 = vmatmul.msk.f32.vlgmr.msra.gmra.mxu2 %vm679_vm6, %v678_v9  ;;  %508 = vrot.lane.b32.xlu1 %v506_v11, %s1066_s16  ;;  %v743_v9 = vperm.slane %v732_v60, 3  ;;  %v741_v11 = vmul.f32 %v740_v4, %v1204_v47 }
 0x2bd   :  { %v744_v15 = vmul.f32 %v743_v9, %v1206_v49 }
 0x2c3   :  { %554 = vrot.lane.b32.xlu1 %v552_v14, %s1065_s2 }
 0x2cd   :  { %v420_v28 = vpop.permute.xlu0 %419 }
 0x2ce   :  { %v422_v30 = vadd.f32 %v420_v28, %v414_v26  ;;  %v753_v26 = vmul.f32 %v752_v21, %v1249_v8 }
 0x2e5   :  { %v1257_v16 = vpop.xlane.xlu1 %382 }
 0x2fd   :  { %v401_v23 = vpop.permute.xlu1 %400 }
 0x2fe   :  { %v403_v24 = vadd.f32 %v401_v23, %v395_v20  ;;  %v747_v20 = vmul.f32 %v746_v13, %v1221_v12  ;;  %v1283_v23 = vld [vmem:[#allocation11 + $0x8] sm:$0xff] }
 0x2ff   :  { %v758_v47 = vperm.slane %v1283_v23, 0  ;;  %v770_v21 = vperm.slane %v1283_v23, 4 }
 0x300   :  { %v406_v29 = vadd.f32 %v405_v22, %v403_v24  ;;  %v755_v24 = vperm.slane %v732_v60, 7 }
 0x302   :  { %v407_v32 = vmax.f32 %v406_v29, 0.0  ;;  %v756_v49 = vmul.f32 %v755_v24, %v1260_v18 }
 0x304   :  { %v408_v33 = vsel %vm164_vm1, %v407_v32, 0.0  ;;  %v759_v32 = vmul.f32 %v758_v47, %v1257_v16  ;;  %v761_v16 = vperm.slane %v1283_v23, 1 }
 0x305   :  { %409 = vadd.xlane.f32.xlu2 %v408_v33  ;;  %v428_v35 = vpop.permute.xlu1 %427 }
 0x306   :  { %v430_v36 = vadd.f32 %v428_v35, %v422_v30  ;;  %v494_v35 = vstv %s856_s8 }
 0x307   :  { %v495_v27 = vmul.f32 %v494_v35, %v1150_v0 }
 0x308   :  { %v433_v37 = vadd.f32 %v432_v34, %v430_v36 }
 0x30a   :  { %v434_v38 = vmax.f32 %v433_v37, 0.0 }
 0x30c   :  { %v435_v40 = vsel %vm164_vm1, %v434_v38, 0.0 }
 0x30d   :  { %436 = vadd.xlane.f32.xlu0 %v435_v40  ;;  %v447_v41 = vpop.permute.xlu1 %446 }
 0x30e   :  { %v449_v43 = vadd.f32 %v447_v41, %v441_v42 }
 0x315   :  { %v455_v45 = vpop.permute.xlu1 %454 }
 0x316   :  { %v457_v48 = vadd.f32 %v455_v45, %v449_v43 }
 0x318   :  { %v460_v25 = vadd.f32 %v459_v44, %v457_v48  ;;  %v764_v48 = vperm.slane %v1283_v23, 2 }
 0x31a   :  { %v461_v52 = vmax.f32 %v460_v25, 0.0 }
 0x31c   :  { %v462_v54 = vsel %vm164_vm1, %v461_v52, 0.0 }
 0x31d   :  { %463 = vadd.xlane.f32.xlu1 %v462_v54  ;;  %473 = vrot.lane.b32.xlu2 %v471_v51, %s1065_s2  ;;  %v482_v29 = vpop.permute.xlu1 %481 }
 0x321   :  { %535 = vrot.lane.b32.xlu0 %v533_v55, %s1066_s16 }
 0x325   :  { %527 = vrot.lane.b32.xlu2 %v525_v57, %s1065_s2  ;;  %v501_v34 = vpop.permute.xlu1 %500  ;;  %s859_s2 = sld [smem:[#allocation8 + $0xd]]  ;;  %v548_v57 = vstv %s864_s21 }
 0x326   :  { %v503_v36 = vadd.f32 %v501_v34, %v495_v27  ;;  %v549_v60 = vmul.f32 %v548_v57, %v1150_v0 }
 0x32b   :  { %v513_v8 = vstv %s859_s2 }
 0x32d   :  { %562 = vrot.lane.b32.xlu2 %v560_v59, %s1066_s16  ;;  %v509_v37 = vpop.permute.xlu1 %508  ;;  %s852_s16 = sld [smem:[#allocation7 + $0xc]] }
 0x32e   :  { %v511_v38 = vadd.f32 %v509_v37, %v503_v36  ;;  %v889_v37 = vld [vmem:[%s1323_s9] ss:$0 sm:$0xff] }
 0x330   :  { %v514_v39 = vadd.f32 %v513_v8, %v511_v38 }
 0x332   :  { %v515_v40 = vmax.f32 %v514_v39, 0.0 }
 0x333   :  { %v467_v43 = vstv %s852_s16 }
 0x334   :  { %v516_v41 = vsel %vm164_vm1, %v515_v40, 0.0  ;;  %v468_v45 = vmul.f32 %v467_v43, %v1150_v0 }
 0x33e   :  { %v699_v1 = vpop.f32.mrf.mxu2 }
 0x33f   :  { %v725_v3 = vadd.f32 %v724_v63, %v699_v1  ;;  %v555_v63 = vpop.permute.xlu1 %554 }
 0x340   :  { %v557_v1 = vadd.f32 %v555_v63, %v549_v60 }
 0x341   :  { %v731_v6 = vadd.f32 %v888_v62, %v725_v3  ;;  %v521_v62 = vstv %s860_s22  ;;  %v567_v3 = vstv %s867_s23 }
 0x342   :  { %v522_v2 = vmul.f32 %v521_v62, %v1150_v0 }
 0x343   :  { %v736_v10 = vadd.f32 %v735_v5, %v731_v6 }
 0x345   :  { %v739_v14 = vadd.f32 %v738_v7, %v736_v10  ;;  %v540_v7 = vstv %s863_s24 }
 0x347   :  { %v742_v19 = vadd.f32 %v741_v11, %v739_v14 }
 0x349   :  { %v745_v22 = vadd.f32 %v744_v15, %v742_v19 }
 0x34b   :  { %v748_v31 = vadd.f32 %v747_v20, %v745_v22  ;;  %517 = vadd.xlane.f32.xlu0 %v516_v41  ;;  %v767_v20 = vperm.slane %v1283_v23, 3 }
 0x34d   :  { %v751_v28 = vadd.f32 %v750_v46, %v748_v31  ;;  %v773_v31 = vperm.slane %v1283_v23, 5 }
 0x34f   :  { %v754_v30 = vadd.f32 %v753_v26, %v751_v28 }
 0x351   :  { %v757_v12 = vadd.f32 %v756_v49, %v754_v30  ;;  %v776_v49 = vperm.slane %v1283_v23, 6  ;;  %v779_v30 = vperm.slane %v1283_v23, 7  ;;  %v793_v23 = vstv %s1324_s10 }
 0x353   :  { %v760_v33 = vadd.f32 %v759_v32, %v757_v12 }
 0x378   :  { %v410_v18 = vpop.xlane.xlu2 %409 }
 0x379   :  { %v762_v42 = vmul.f32 %v761_v16, %v410_v18 }
 0x37b   :  { %v763_v44 = vadd.f32 %v762_v42, %v760_v33 }
 0x380   :  { %v474_v50 = vpop.permute.xlu2 %473  ;;  %v437_v25 = vpop.xlane.xlu0 %436 }
 0x381   :  { %v476_v51 = vadd.f32 %v474_v50, %v468_v45  ;;  %v765_v52 = vmul.f32 %v764_v48, %v437_v25 }
 0x383   :  { %v484_v54 = vadd.f32 %v482_v29, %v476_v51  ;;  %v766_v55 = vadd.f32 %v765_v52, %v763_v44 }
 0x385   :  { %v487_v56 = vadd.f32 %v486_v53, %v484_v54 }
 0x387   :  { %v488_v58 = vmax.f32 %v487_v56, 0.0 }
 0x388   :  { %v528_v59 = vpop.permute.xlu2 %527 }
 0x389   :  { %v489_v61 = vsel %vm164_vm1, %v488_v58, 0.0  ;;  %v530_v6 = vadd.f32 %v528_v59, %v522_v2 }
 0x38a   :  { %490 = vadd.xlane.f32.xlu2 %v489_v61 }
 0x390   :  { %v563_v4 = vpop.permute.xlu2 %562  ;;  %v464_v0 = vpop.xlane.xlu1 %463 }
 0x391   :  { %v565_v5 = vadd.f32 %v563_v4, %v557_v1  ;;  %v768_v46 = vmul.f32 %v767_v20, %v464_v0 }
 0x393   :  { %v536_v9 = vpop.permute.xlu0 %535  ;;  %v568_v10 = vadd.f32 %v567_v3, %v565_v5  ;;  %v769_v47 = vadd.f32 %v768_v46, %v766_v55 }
 0x394   :  { %v538_v11 = vadd.f32 %v536_v9, %v530_v6 }
 0x395   :  { %v569_v13 = vmax.f32 %v568_v10, 0.0 }
 0x396   :  { %v541_v14 = vadd.f32 %v540_v7, %v538_v11 }
 0x397   :  { %v570_v15 = vsel %vm164_vm1, %v569_v13, 0.0 }
 0x398   :  { %v542_v17 = vmax.f32 %v541_v14, 0.0  ;;  %571 = vadd.xlane.f32.xlu2 %v570_v15 }
 0x39a   :  { %v543_v19 = vsel %vm164_vm1, %v542_v17, 0.0 }
 0x39b   :  { %544 = vadd.xlane.f32.xlu1 %v543_v19 }
 0x3be   :  { %v518_v26 = vpop.xlane.xlu0 %517 }
 0x3bf   :  { %v774_v29 = vmul.f32 %v773_v31, %v518_v26 }
 0x3fd   :  { %v491_v22 = vpop.xlane.xlu2 %490 }
 0x3fe   :  { %v771_v24 = vmul.f32 %v770_v21, %v491_v22 }
 0x400   :  { %v772_v28 = vadd.f32 %v771_v24, %v769_v47 }
 0x402   :  { %v775_v33 = vadd.f32 %v774_v29, %v772_v28 }
 0x40b   :  { %v572_v32 = vpop.xlane.xlu2 %571 }
 0x40c   :  { %v780_v35 = vmul.f32 %v779_v30, %v572_v32 }
 0x40e   :  { %v545_v12 = vpop.xlane.xlu1 %544 }
 0x40f   :  { %v777_v34 = vmul.f32 %v776_v49, %v545_v12 }
 0x411   :  { %v778_v27 = vadd.f32 %v777_v34, %v775_v33 }
 0x413   :  { %v781_v36 = vadd.f32 %v780_v35, %v778_v27 }
 0x415   :  { %v782_v8 = vmax.f32 %v781_v36, 0.0 }
 0x417   :  { %v787_v38 = vmul.f32 %v889_v37, %v782_v8 }
 0x419   :  { %v789_v39 = vsel %vm788_vm7, %v787_v38, 0.0 }
 0x41a   :  { %790 = vadd.xlane.f32.xlu0 %v789_v39 }
 0x48d   :  { %v791_v40 = vpop.xlane.xlu0 %790 }
 0x48e   :  { %v794_v41 = vadd.f32 %v793_v23, %v791_v40 }
 0x490   :  { %796 = vst.msk [vmem:[%s1325_s11] sm:$0x3] %vm795_vm8, %v794_v41 }
 0x491   :  { %801 = vsyncpa [#allocation4], 1 }
 0x492   :  { %802 = vsyncpa [#allocation10], 1 }
 0x493   :  { %803 = vsyncpa [#allocation13], 1 }
 0x494   :  { %804 = vsyncpa [#allocation5], 1 }
 0x495   :  { %805 = vsyncpa [#allocation6], 1 }

</bundles_post_ra>
